<compile_context>
chip_gen: v7x
topology: tpu7x:2x2x1
jax: 0.10.0
libtpu: 0.0.40
codegen_flags: <defaults>
</compile_context>

<pallas_src>
import functools

import numpy as np

import jax
import jax.numpy as jnp
from jax.experimental import pallas as pl
from jax.experimental.pallas import tpu as pltpu


def _sigmoid(x):
    # sigmoid(x) = 0.5 * tanh(x / 2) + 0.5 : EUP tanh + 2 VALU ops, no divide.
    return 0.5 * jnp.tanh(0.5 * x) + 0.5


def _convlstm_kernel(mask_ref, x_ref, h_ref, c_ref, w_ref, b_ref,
                     hid_ref, cell_ref, im_ref, gates_ref,
                     *, H, W, K, cin, hid):
    """One batch element of the fused ConvLSTM step (all tensors channel-major).

    mask_ref:  (K*K, H*W)      per-tap zero-padding border masks (0/1 f32)
    x_ref:     (1, cin, H*W)   input
    h_ref:     (1, hid, H*W)   previous hidden state
    c_ref:     (1, hid, H*W)   previous cell state
    w_ref:     (4*hid, K*K*C)  conv weight flattened to the im2col column order
    b_ref:     (4*hid, 1)      conv bias
    hid_ref:   (1, hid, H*W)   new hidden state (output)
    cell_ref:  (1, hid, H*W)   new cell state   (output)
    im_ref:    (K*K*C, H*W)    f32 VMEM scratch: im2col matrix
    gates_ref: (4*hid, H*W)    f32 VMEM scratch: gate pre-activations
    """
    HW = H * W
    pad = K // 2
    h_rows = K * K * hid                      # rows [0, h_rows) hold the hidden taps

    x = x_ref[0].astype(jnp.float32)          # (cin, HW)
    h = h_ref[0].astype(jnp.float32)          # (hid, HW)

    def shift_flat(v, s):
        # out[:, p] = v[:, p + s] if 0 <= p + s < HW else 0     (s: Python int)
        if s == 0:
            return v
        rows = v.shape[0]
        if s > 0:
            return jnp.concatenate(
                [v[:, s:], jnp.zeros((rows, s), v.dtype)], axis=1)
        return jnp.concatenate(
            [jnp.zeros((rows, -s), v.dtype), v[:, :HW + s]], axis=1)

    # --- build the im2col matrix in VMEM: K*K shifted, border-masked taps ----
    for t in range(K * K):
        kh, kw = divmod(t, K)
        s = (kh - pad) * W + (kw - pad)       # flat spatial shift of tap (kh, kw)
        m = mask_ref[t:t + 1, :]              # (1, HW), broadcast over channels
        im_ref[t * hid:(t + 1) * hid, :] = shift_flat(h, s) * m
        im_ref[h_rows + t * cin:h_rows + (t + 1) * cin, :] = shift_flat(x, s) * m

    # --- whole conv as ONE deep MXU contraction: (4h, K*K*C) @ (K*K*C, HW) ---
    gates_ref[...] = jnp.dot(w_ref[...], im_ref[...],
                             preferred_element_type=jnp.float32)

    def gate(g):                              # pre-activation of gate slice g
        lo, hi = g * hid, (g + 1) * hid
        return gates_ref[lo:hi, :] + b_ref[lo:hi, :]

    i_g = _sigmoid(gate(0))                   # in gate
    r_g = _sigmoid(gate(1))                   # remember (forget) gate
    o_g = _sigmoid(gate(2))                   # out gate
    g_g = jnp.tanh(gate(3))                   # cell gate

    prev_c = c_ref[0].astype(jnp.float32)
    cell = r_g * prev_c + i_g * g_g
    hidden = o_g * jnp.tanh(cell)

    cell_ref[0] = cell.astype(cell_ref.dtype)   # lane-dense, unmasked stores
    hid_ref[0] = hidden.astype(hid_ref.dtype)


def _build_tap_masks(H, W, K):
    """(K*K, H*W) 0/1 masks: which output pixels read inside the image per tap."""
    pad = K // 2
    yy, xx = np.meshgrid(np.arange(H), np.arange(W), indexing="ij")
    masks = np.empty((K * K, H * W), np.float32)
    for t in range(K * K):
        kh, kw = divmod(t, K)
        dy, dx = kh - pad, kw - pad
        valid = ((yy + dy >= 0) & (yy + dy < H) &
                 (xx + dx >= 0) & (xx + dx < W))
        masks[t] = valid.reshape(-1).astype(np.float32)
    return jnp.asarray(masks)


def prepare_gate_params(weight_oihw, bias, *, input_size, hidden_size,
                        kernel_size):
    """Flatten Conv2d(OIHW) weights ONCE into the kernel's im2col column order.

    Columns are [all K*K taps of the hidden channels | all K*K taps of the input
    channels], tap-major / channel-minor, matching the in-kernel im2col rows.
    """
    cin, hid, K = input_size, hidden_size, kernel_size
    cout = 4 * hid
    assert weight_oihw.shape == (cout, cin + hid, K, K)
    w_h = jnp.transpose(weight_oihw[:, cin:, :, :], (0, 2, 3, 1)
                        ).reshape(cout, K * K * hid)
    w_x = jnp.transpose(weight_oihw[:, :cin, :, :], (0, 2, 3, 1)
                        ).reshape(cout, K * K * cin)
    w_flat = jnp.concatenate([w_h, w_x], axis=1).astype(jnp.float32)
    b_col = bias.reshape(cout, 1).astype(jnp.float32)
    return w_flat, b_col


@functools.partial(jax.jit, static_argnames=("hidden_size", "kernel_size"))
def conv_lstm_step(x_nchw, w_flat, b_col, prev_hidden, prev_cell, *,
                   hidden_size, kernel_size):
    """One ConvLSTM step.  States / outputs are (N, hidden_size, H, W)."""
    N, cin, H, W = x_nchw.shape
    hid, K = hidden_size, kernel_size
    assert K % 2 == 1, "Conv2d(padding=K//2) keeps the spatial size only for odd K"
    C = cin + hid
    cout = 4 * hid
    HW = H * W
    dtype = x_nchw.dtype
    assert w_flat.shape == (cout, K * K * C) and b_col.shape == (cout, 1)

    masks = _build_tap_masks(H, W, K)                  # (K*K, HW), trace-time const
    x_flat = x_nchw.reshape(N, cin, HW)                # free reshapes (row-major)
    h_flat = prev_hidden.reshape(N, hid, HW)
    c_flat = prev_cell.reshape(N, hid, HW)

    kernel = functools.partial(_convlstm_kernel, H=H, W=W, K=K, cin=cin, hid=hid)

    hid_out, cell_out = pl.pallas_call(
        kernel,
        out_shape=(jax.ShapeDtypeStruct((N, hid, HW), dtype),
                   jax.ShapeDtypeStruct((N, hid, HW), dtype)),
        grid_spec=pltpu.PrefetchScalarGridSpec(
            num_scalar_prefetch=0,
            grid=(N,),
            in_specs=[
                pl.BlockSpec((K * K, HW), lambda n: (0, 0)),        # border masks
                pl.BlockSpec((1, cin, HW), lambda n: (n, 0, 0)),    # input
                pl.BlockSpec((1, hid, HW), lambda n: (n, 0, 0)),    # prev hidden
                pl.BlockSpec((1, hid, HW), lambda n: (n, 0, 0)),    # prev cell
                pl.BlockSpec((cout, K * K * C), lambda n: (0, 0)),  # flat weights
                pl.BlockSpec((cout, 1), lambda n: (0, 0)),          # bias column
            ],
            out_specs=(
                pl.BlockSpec((1, hid, HW), lambda n: (n, 0, 0)),
                pl.BlockSpec((1, hid, HW), lambda n: (n, 0, 0)),
            ),
            scratch_shapes=[
                pltpu.VMEM((K * K * C, HW), jnp.float32),   # im2col matrix
                pltpu.VMEM((cout, HW), jnp.float32),        # gate pre-activations
            ],
        ),
        compiler_params=pltpu.CompilerParams(
            dimension_semantics=("parallel",)),
    )(masks, x_flat, h_flat, c_flat, w_flat, b_col)

    return (hid_out.reshape(N, hid, H, W), cell_out.reshape(N, hid, H, W))


def conv_lstm(input_nchw, weight_oihw, bias, prev_state=None, *, hidden_size,
              kernel_size):
    """Module-like entry: ConvLSTM.forward -> (hidden, cell)."""
    N, cin, H, W = input_nchw.shape
    w_flat, b_col = prepare_gate_params(weight_oihw, bias, input_size=cin,
                                        hidden_size=hidden_size,
                                        kernel_size=kernel_size)
    if prev_state is None:
        prev_hidden = jnp.zeros((N, hidden_size, H, W), input_nchw.dtype)
        prev_cell = jnp.zeros((N, hidden_size, H, W), input_nchw.dtype)
    else:
        prev_hidden, prev_cell = prev_state
    return conv_lstm_step(input_nchw, w_flat, b_col, prev_hidden, prev_cell,
                          hidden_size=hidden_size, kernel_size=kernel_size)


def _reference(input_nchw, weight_oihw, bias, prev_state, *, hidden_size,
               kernel_size):
    """Pure-JAX reference matching the PyTorch forward."""
    N, _, H, W = input_nchw.shape
    hid = hidden_size
    if prev_state is None:
        prev_hidden = jnp.zeros((N, hid, H, W), input_nchw.dtype)
        prev_cell = jnp.zeros((N, hid, H, W), input_nchw.dtype)
    else:
        prev_hidden, prev_cell = prev_state
    stacked = jnp.concatenate([input_nchw, prev_hidden], axis=1)
    pad = kernel_size // 2
    gates = jax.lax.conv_general_dilated(
        stacked, weight_oihw, window_strides=(1, 1),
        padding=[(pad, pad), (pad, pad)],
        dimension_numbers=("NCHW", "OIHW", "NCHW")) + bias.reshape(1, -1, 1, 1)
    i_g = jax.nn.sigmoid(gates[:, 0 * hid:1 * hid])
    r_g = jax.nn.sigmoid(gates[:, 1 * hid:2 * hid])
    o_g = jax.nn.sigmoid(gates[:, 2 * hid:3 * hid])
    g_g = jnp.tanh(gates[:, 3 * hid:4 * hid])
    cell = r_g * prev_cell + i_g * g_g
    hidden = o_g * jnp.tanh(cell)
    return hidden, cell


if __name__ == "__main__":
    # Module config: ConvLSTM(input_size=4, hidden_size=32, kernel_size=3)
    N, Cin, H, W = 2, 4, 16, 16
    HID, K = 32, 3

    key = jax.random.PRNGKey(0)
    kx, khd, kcl, kwt, kbs = jax.random.split(key, 5)
    x = jax.random.normal(kx, (N, Cin, H, W), dtype=jnp.float32)
    prev_h = jax.random.normal(khd, (N, HID, H, W), dtype=jnp.float32) * 0.5
    prev_c = jax.random.normal(kcl, (N, HID, H, W), dtype=jnp.float32) * 0.5
    # Conv2d(Cin+HID, 4*HID, K)-shaped parameters (synthetic, deterministic).
    weight = jax.random.normal(kwt, (4 * HID, Cin + HID, K, K),
                               dtype=jnp.float32) * 0.05
    bias = jax.random.normal(kbs, (4 * HID,), dtype=jnp.float32) * 0.1

    # Weight/bias flattening happens ONCE (not per time step).
    w_flat, b_col = prepare_gate_params(weight, bias, input_size=Cin,
                                        hidden_size=HID, kernel_size=K)

    # With an explicit previous state (exercises remember-gate * prev_cell path).
    hid1, cell1 = conv_lstm_step(x, w_flat, b_col, prev_h, prev_c,
                                 hidden_size=HID, kernel_size=K)
    # And with the module's default zero state (prev_state=None branch).
    hid0, cell0 = conv_lstm(x, weight, bias, None, hidden_size=HID, kernel_size=K)
    jax.block_until_ready((hid1, cell1, hid0, cell0))

    ref_h1, ref_c1 = _reference(x, weight, bias, (prev_h, prev_c),
                                hidden_size=HID, kernel_size=K)
    ref_h0, ref_c0 = _reference(x, weight, bias, None,
                                hidden_size=HID, kernel_size=K)
    jax.block_until_ready((ref_h1, ref_c1, ref_h0, ref_c0))

    assert hid1.shape == (N, HID, H, W) and cell1.shape == (N, HID, H, W)
    for got, want in ((hid1, ref_h1), (cell1, ref_c1),
                      (hid0, ref_h0), (cell0, ref_c0)):
        err = float(jnp.max(jnp.abs(got - want)))
        assert jnp.allclose(got, want, atol=1e-4, rtol=1e-4), err

    print("KERNEL_OK")
</pallas_src>

<mosaic_0001>
module attributes {stable_mosaic.version = 11 : i64} {
  func.func @_convlstm_kernel(%arg0: i32, %arg1: memref<9x256xf32, #tpu.memory_space<vmem>>, %arg2: memref<1x4x256xf32, #tpu.memory_space<vmem>>, %arg3: memref<1x32x256xf32, #tpu.memory_space<vmem>>, %arg4: memref<1x32x256xf32, #tpu.memory_space<vmem>>, %arg5: memref<128x324xf32, #tpu.memory_space<vmem>>, %arg6: memref<128x1xf32, #tpu.memory_space<vmem>>, %arg7: memref<1x32x256xf32, #tpu.memory_space<vmem>>, %arg8: memref<1x32x256xf32, #tpu.memory_space<vmem>>, %arg9: memref<324x256xf32, #tpu.memory_space<vmem>>, %arg10: memref<128x256xf32, #tpu.memory_space<vmem>>) attributes {dimension_semantics = [#tpu.dimension_semantics<parallel>], iteration_bounds = array<i64: 2>, scalar_prefetch = 0 : i64, scratch_operands = 2 : i64, tpu.core_type = #tpu.core_type<tc>, window_params = [{pipeline_mode = #tpu.pipeline_mode<synchronous>, transform_indices = @transform_0, window_bounds = array<i64: 9, 256>}, {transform_indices = @transform_1, window_bounds = array<i64: 1, 4, 256>}, {transform_indices = @transform_2, window_bounds = array<i64: 1, 32, 256>}, {transform_indices = @transform_3, window_bounds = array<i64: 1, 32, 256>}, {pipeline_mode = #tpu.pipeline_mode<synchronous>, transform_indices = @transform_4, window_bounds = array<i64: 128, 324>}, {pipeline_mode = #tpu.pipeline_mode<synchronous>, transform_indices = @transform_5, window_bounds = array<i64: 128, 1>}, {transform_indices = @transform_6, window_bounds = array<i64: 1, 32, 256>}, {transform_indices = @transform_7, window_bounds = array<i64: 1, 32, 256>}]} {
    %c0 = arith.constant 0 : index
    %c0_0 = arith.constant 0 : index
    %c0_1 = arith.constant 0 : index
    %0 = vector.load %arg2[%c0, %c0_0, %c0_1] : memref<1x4x256xf32, #tpu.memory_space<vmem>>, vector<1x4x256xf32>
    %1 = vector.shape_cast %0 : vector<1x4x256xf32> to vector<4x256xf32>
    %c0_2 = arith.constant 0 : index
    %c0_3 = arith.constant 0 : index
    %c0_4 = arith.constant 0 : index
    %2 = vector.load %arg3[%c0_2, %c0_3, %c0_4] : memref<1x32x256xf32, #tpu.memory_space<vmem>>, vector<1x32x256xf32>
    %3 = vector.shape_cast %2 : vector<1x32x256xf32> to vector<32x256xf32>
    %c0_5 = arith.constant 0 : index
    %c0_6 = arith.constant 0 : index
    %4 = vector.load %arg1[%c0_5, %c0_6] : memref<9x256xf32, #tpu.memory_space<vmem>>, vector<1x256xf32>
    %cst = arith.constant 0.000000e+00 : f32
    %5 = vector.broadcast %cst : f32 to vector<32x17xf32>
    %6 = vector.extract_strided_slice %3 {offsets = [0, 0], sizes = [32, 239], strides = [1, 1]} : vector<32x256xf32> to vector<32x239xf32>
    %7 = tpu.concatenate %5, %6 in 1 : vector<32x17xf32>, vector<32x239xf32> -> vector<32x256xf32>
    %8 = vector.broadcast %4 : vector<1x256xf32> to vector<32x256xf32>
    %9 = arith.mulf %7, %8 : vector<32x256xf32>
    %c0_7 = arith.constant 0 : index
    %c0_8 = arith.constant 0 : index
    %10 = vector.load %arg9[%c0_7, %c0_8] : memref<324x256xf32, #tpu.memory_space<vmem>>, vector<32x256xf32>
    tpu.vector_store %arg9[%c0_7, %c0_8], %9 {strides = array<i32>} : memref<324x256xf32, #tpu.memory_space<vmem>>, vector<32x256xf32>,
    %cst_9 = arith.constant 0.000000e+00 : f32
    %11 = vector.broadcast %cst_9 : f32 to vector<4x17xf32>
    %12 = vector.extract_strided_slice %1 {offsets = [0, 0], sizes = [4, 239], strides = [1, 1]} : vector<4x256xf32> to vector<4x239xf32>
    %13 = tpu.concatenate %11, %12 in 1 : vector<4x17xf32>, vector<4x239xf32> -> vector<4x256xf32>
    %14 = vector.broadcast %4 : vector<1x256xf32> to vector<4x256xf32>
    %15 = arith.mulf %13, %14 : vector<4x256xf32>
    %c288 = arith.constant 288 : index
    %c0_10 = arith.constant 0 : index
    %16 = vector.load %arg9[%c288, %c0_10] : memref<324x256xf32, #tpu.memory_space<vmem>>, vector<4x256xf32>
    tpu.vector_store %arg9[%c288, %c0_10], %15 {strides = array<i32>} : memref<324x256xf32, #tpu.memory_space<vmem>>, vector<4x256xf32>,
    %c1 = arith.constant 1 : index
    %c0_11 = arith.constant 0 : index
    %17 = vector.load %arg1[%c1, %c0_11] : memref<9x256xf32, #tpu.memory_space<vmem>>, vector<1x256xf32>
    %cst_12 = arith.constant 0.000000e+00 : f32
    %18 = vector.broadcast %cst_12 : f32 to vector<32x16xf32>
    %19 = vector.extract_strided_slice %3 {offsets = [0, 0], sizes = [32, 240], strides = [1, 1]} : vector<32x256xf32> to vector<32x240xf32>
    %20 = tpu.concatenate %18, %19 in 1 : vector<32x16xf32>, vector<32x240xf32> -> vector<32x256xf32>
    %21 = vector.broadcast %17 : vector<1x256xf32> to vector<32x256xf32>
    %22 = arith.mulf %20, %21 : vector<32x256xf32>
    %c32 = arith.constant 32 : index
    %c0_13 = arith.constant 0 : index
    %23 = vector.load %arg9[%c32, %c0_13] : memref<324x256xf32, #tpu.memory_space<vmem>>, vector<32x256xf32>
    tpu.vector_store %arg9[%c32, %c0_13], %22 {strides = array<i32>} : memref<324x256xf32, #tpu.memory_space<vmem>>, vector<32x256xf32>,
    %cst_14 = arith.constant 0.000000e+00 : f32
    %24 = vector.broadcast %cst_14 : f32 to vector<4x16xf32>
    %25 = vector.extract_strided_slice %1 {offsets = [0, 0], sizes = [4, 240], strides = [1, 1]} : vector<4x256xf32> to vector<4x240xf32>
    %26 = tpu.concatenate %24, %25 in 1 : vector<4x16xf32>, vector<4x240xf32> -> vector<4x256xf32>
    %27 = vector.broadcast %17 : vector<1x256xf32> to vector<4x256xf32>
    %28 = arith.mulf %26, %27 : vector<4x256xf32>
    %c292 = arith.constant 292 : index
    %c0_15 = arith.constant 0 : index
    %29 = vector.load %arg9[%c292, %c0_15] : memref<324x256xf32, #tpu.memory_space<vmem>>, vector<4x256xf32>
    tpu.vector_store %arg9[%c292, %c0_15], %28 {strides = array<i32>} : memref<324x256xf32, #tpu.memory_space<vmem>>, vector<4x256xf32>,
    %c2 = arith.constant 2 : index
    %c0_16 = arith.constant 0 : index
    %30 = vector.load %arg1[%c2, %c0_16] : memref<9x256xf32, #tpu.memory_space<vmem>>, vector<1x256xf32>
    %cst_17 = arith.constant 0.000000e+00 : f32
    %31 = vector.broadcast %cst_17 : f32 to vector<32x15xf32>
    %32 = vector.extract_strided_slice %3 {offsets = [0, 0], sizes = [32, 241], strides = [1, 1]} : vector<32x256xf32> to vector<32x241xf32>
    %33 = tpu.concatenate %31, %32 in 1 : vector<32x15xf32>, vector<32x241xf32> -> vector<32x256xf32>
    %34 = vector.broadcast %30 : vector<1x256xf32> to vector<32x256xf32>
    %35 = arith.mulf %33, %34 : vector<32x256xf32>
    %c64 = arith.constant 64 : index
    %c0_18 = arith.constant 0 : index
    %36 = vector.load %arg9[%c64, %c0_18] : memref<324x256xf32, #tpu.memory_space<vmem>>, vector<32x256xf32>
    tpu.vector_store %arg9[%c64, %c0_18], %35 {strides = array<i32>} : memref<324x256xf32, #tpu.memory_space<vmem>>, vector<32x256xf32>,
    %cst_19 = arith.constant 0.000000e+00 : f32
    %37 = vector.broadcast %cst_19 : f32 to vector<4x15xf32>
    %38 = vector.extract_strided_slice %1 {offsets = [0, 0], sizes = [4, 241], strides = [1, 1]} : vector<4x256xf32> to vector<4x241xf32>
    %39 = tpu.concatenate %37, %38 in 1 : vector<4x15xf32>, vector<4x241xf32> -> vector<4x256xf32>
    %40 = vector.broadcast %30 : vector<1x256xf32> to vector<4x256xf32>
    %41 = arith.mulf %39, %40 : vector<4x256xf32>
    %c296 = arith.constant 296 : index
    %c0_20 = arith.constant 0 : index
    %42 = vector.load %arg9[%c296, %c0_20] : memref<324x256xf32, #tpu.memory_space<vmem>>, vector<4x256xf32>
    tpu.vector_store %arg9[%c296, %c0_20], %41 {strides = array<i32>} : memref<324x256xf32, #tpu.memory_space<vmem>>, vector<4x256xf32>,
    %c3 = arith.constant 3 : index
    %c0_21 = arith.constant 0 : index
    %43 = vector.load %arg1[%c3, %c0_21] : memref<9x256xf32, #tpu.memory_space<vmem>>, vector<1x256xf32>
    %cst_22 = arith.constant 0.000000e+00 : f32
    %44 = vector.broadcast %cst_22 : f32 to vector<32x1xf32>
    %45 = vector.extract_strided_slice %3 {offsets = [0, 0], sizes = [32, 255], strides = [1, 1]} : vector<32x256xf32> to vector<32x255xf32>
    %46 = tpu.concatenate %44, %45 in 1 : vector<32x1xf32>, vector<32x255xf32> -> vector<32x256xf32>
    %47 = vector.broadcast %43 : vector<1x256xf32> to vector<32x256xf32>
    %48 = arith.mulf %46, %47 : vector<32x256xf32>
    %c96 = arith.constant 96 : index
    %c0_23 = arith.constant 0 : index
    %49 = vector.load %arg9[%c96, %c0_23] : memref<324x256xf32, #tpu.memory_space<vmem>>, vector<32x256xf32>
    tpu.vector_store %arg9[%c96, %c0_23], %48 {strides = array<i32>} : memref<324x256xf32, #tpu.memory_space<vmem>>, vector<32x256xf32>,
    %cst_24 = arith.constant 0.000000e+00 : f32
    %50 = vector.broadcast %cst_24 : f32 to vector<4x1xf32>
    %51 = vector.extract_strided_slice %1 {offsets = [0, 0], sizes = [4, 255], strides = [1, 1]} : vector<4x256xf32> to vector<4x255xf32>
    %52 = tpu.concatenate %50, %51 in 1 : vector<4x1xf32>, vector<4x255xf32> -> vector<4x256xf32>
    %53 = vector.broadcast %43 : vector<1x256xf32> to vector<4x256xf32>
    %54 = arith.mulf %52, %53 : vector<4x256xf32>
    %c300 = arith.constant 300 : index
    %c0_25 = arith.constant 0 : index
    %55 = vector.load %arg9[%c300, %c0_25] : memref<324x256xf32, #tpu.memory_space<vmem>>, vector<4x256xf32>
    tpu.vector_store %arg9[%c300, %c0_25], %54 {strides = array<i32>} : memref<324x256xf32, #tpu.memory_space<vmem>>, vector<4x256xf32>,
    %c4 = arith.constant 4 : index
    %c0_26 = arith.constant 0 : index
    %56 = vector.load %arg1[%c4, %c0_26] : memref<9x256xf32, #tpu.memory_space<vmem>>, vector<1x256xf32>
    %57 = vector.broadcast %56 : vector<1x256xf32> to vector<32x256xf32>
    %58 = arith.mulf %3, %57 : vector<32x256xf32>
    %c128 = arith.constant 128 : index
    %c0_27 = arith.constant 0 : index
    %59 = vector.load %arg9[%c128, %c0_27] : memref<324x256xf32, #tpu.memory_space<vmem>>, vector<32x256xf32>
    tpu.vector_store %arg9[%c128, %c0_27], %58 {strides = array<i32>} : memref<324x256xf32, #tpu.memory_space<vmem>>, vector<32x256xf32>,
    %60 = vector.broadcast %56 : vector<1x256xf32> to vector<4x256xf32>
    %61 = arith.mulf %1, %60 : vector<4x256xf32>
    %c304 = arith.constant 304 : index
    %c0_28 = arith.constant 0 : index
    %62 = vector.load %arg9[%c304, %c0_28] : memref<324x256xf32, #tpu.memory_space<vmem>>, vector<4x256xf32>
    tpu.vector_store %arg9[%c304, %c0_28], %61 {strides = array<i32>} : memref<324x256xf32, #tpu.memory_space<vmem>>, vector<4x256xf32>,
    %c5 = arith.constant 5 : index
    %c0_29 = arith.constant 0 : index
    %63 = vector.load %arg1[%c5, %c0_29] : memref<9x256xf32, #tpu.memory_space<vmem>>, vector<1x256xf32>
    %64 = vector.extract_strided_slice %3 {offsets = [0, 1], sizes = [32, 255], strides = [1, 1]} : vector<32x256xf32> to vector<32x255xf32>
    %cst_30 = arith.constant 0.000000e+00 : f32
    %65 = vector.broadcast %cst_30 : f32 to vector<32x1xf32>
    %66 = tpu.concatenate %64, %65 in 1 : vector<32x255xf32>, vector<32x1xf32> -> vector<32x256xf32>
    %67 = vector.broadcast %63 : vector<1x256xf32> to vector<32x256xf32>
    %68 = arith.mulf %66, %67 : vector<32x256xf32>
    %c160 = arith.constant 160 : index
    %c0_31 = arith.constant 0 : index
    %69 = vector.load %arg9[%c160, %c0_31] : memref<324x256xf32, #tpu.memory_space<vmem>>, vector<32x256xf32>
    tpu.vector_store %arg9[%c160, %c0_31], %68 {strides = array<i32>} : memref<324x256xf32, #tpu.memory_space<vmem>>, vector<32x256xf32>,
    %70 = vector.extract_strided_slice %1 {offsets = [0, 1], sizes = [4, 255], strides = [1, 1]} : vector<4x256xf32> to vector<4x255xf32>
    %cst_32 = arith.constant 0.000000e+00 : f32
    %71 = vector.broadcast %cst_32 : f32 to vector<4x1xf32>
    %72 = tpu.concatenate %70, %71 in 1 : vector<4x255xf32>, vector<4x1xf32> -> vector<4x256xf32>
    %73 = vector.broadcast %63 : vector<1x256xf32> to vector<4x256xf32>
    %74 = arith.mulf %72, %73 : vector<4x256xf32>
    %c308 = arith.constant 308 : index
    %c0_33 = arith.constant 0 : index
    %75 = vector.load %arg9[%c308, %c0_33] : memref<324x256xf32, #tpu.memory_space<vmem>>, vector<4x256xf32>
    tpu.vector_store %arg9[%c308, %c0_33], %74 {strides = array<i32>} : memref<324x256xf32, #tpu.memory_space<vmem>>, vector<4x256xf32>,
    %c6 = arith.constant 6 : index
    %c0_34 = arith.constant 0 : index
    %76 = vector.load %arg1[%c6, %c0_34] : memref<9x256xf32, #tpu.memory_space<vmem>>, vector<1x256xf32>
    %77 = vector.extract_strided_slice %3 {offsets = [0, 15], sizes = [32, 241], strides = [1, 1]} : vector<32x256xf32> to vector<32x241xf32>
    %cst_35 = arith.constant 0.000000e+00 : f32
    %78 = vector.broadcast %cst_35 : f32 to vector<32x15xf32>
    %79 = tpu.concatenate %77, %78 in 1 : vector<32x241xf32>, vector<32x15xf32> -> vector<32x256xf32>
    %80 = vector.broadcast %76 : vector<1x256xf32> to vector<32x256xf32>
    %81 = arith.mulf %79, %80 : vector<32x256xf32>
    %c192 = arith.constant 192 : index
    %c0_36 = arith.constant 0 : index
    %82 = vector.load %arg9[%c192, %c0_36] : memref<324x256xf32, #tpu.memory_space<vmem>>, vector<32x256xf32>
    tpu.vector_store %arg9[%c192, %c0_36], %81 {strides = array<i32>} : memref<324x256xf32, #tpu.memory_space<vmem>>, vector<32x256xf32>,
    %83 = vector.extract_strided_slice %1 {offsets = [0, 15], sizes = [4, 241], strides = [1, 1]} : vector<4x256xf32> to vector<4x241xf32>
    %cst_37 = arith.constant 0.000000e+00 : f32
    %84 = vector.broadcast %cst_37 : f32 to vector<4x15xf32>
    %85 = tpu.concatenate %83, %84 in 1 : vector<4x241xf32>, vector<4x15xf32> -> vector<4x256xf32>
    %86 = vector.broadcast %76 : vector<1x256xf32> to vector<4x256xf32>
    %87 = arith.mulf %85, %86 : vector<4x256xf32>
    %c312 = arith.constant 312 : index
    %c0_38 = arith.constant 0 : index
    %88 = vector.load %arg9[%c312, %c0_38] : memref<324x256xf32, #tpu.memory_space<vmem>>, vector<4x256xf32>
    tpu.vector_store %arg9[%c312, %c0_38], %87 {strides = array<i32>} : memref<324x256xf32, #tpu.memory_space<vmem>>, vector<4x256xf32>,
    %c7 = arith.constant 7 : index
    %c0_39 = arith.constant 0 : index
    %89 = vector.load %arg1[%c7, %c0_39] : memref<9x256xf32, #tpu.memory_space<vmem>>, vector<1x256xf32>
    %90 = vector.extract_strided_slice %3 {offsets = [0, 16], sizes = [32, 240], strides = [1, 1]} : vector<32x256xf32> to vector<32x240xf32>
    %cst_40 = arith.constant 0.000000e+00 : f32
    %91 = vector.broadcast %cst_40 : f32 to vector<32x16xf32>
    %92 = tpu.concatenate %90, %91 in 1 : vector<32x240xf32>, vector<32x16xf32> -> vector<32x256xf32>
    %93 = vector.broadcast %89 : vector<1x256xf32> to vector<32x256xf32>
    %94 = arith.mulf %92, %93 : vector<32x256xf32>
    %c224 = arith.constant 224 : index
    %c0_41 = arith.constant 0 : index
    %95 = vector.load %arg9[%c224, %c0_41] : memref<324x256xf32, #tpu.memory_space<vmem>>, vector<32x256xf32>
    tpu.vector_store %arg9[%c224, %c0_41], %94 {strides = array<i32>} : memref<324x256xf32, #tpu.memory_space<vmem>>, vector<32x256xf32>,
    %96 = vector.extract_strided_slice %1 {offsets = [0, 16], sizes = [4, 240], strides = [1, 1]} : vector<4x256xf32> to vector<4x240xf32>
    %cst_42 = arith.constant 0.000000e+00 : f32
    %97 = vector.broadcast %cst_42 : f32 to vector<4x16xf32>
    %98 = tpu.concatenate %96, %97 in 1 : vector<4x240xf32>, vector<4x16xf32> -> vector<4x256xf32>
    %99 = vector.broadcast %89 : vector<1x256xf32> to vector<4x256xf32>
    %100 = arith.mulf %98, %99 : vector<4x256xf32>
    %c316 = arith.constant 316 : index
    %c0_43 = arith.constant 0 : index
    %101 = vector.load %arg9[%c316, %c0_43] : memref<324x256xf32, #tpu.memory_space<vmem>>, vector<4x256xf32>
    tpu.vector_store %arg9[%c316, %c0_43], %100 {strides = array<i32>} : memref<324x256xf32, #tpu.memory_space<vmem>>, vector<4x256xf32>,
    %c8 = arith.constant 8 : index
    %c0_44 = arith.constant 0 : index
    %102 = vector.load %arg1[%c8, %c0_44] : memref<9x256xf32, #tpu.memory_space<vmem>>, vector<1x256xf32>
    %103 = vector.extract_strided_slice %3 {offsets = [0, 17], sizes = [32, 239], strides = [1, 1]} : vector<32x256xf32> to vector<32x239xf32>
    %cst_45 = arith.constant 0.000000e+00 : f32
    %104 = vector.broadcast %cst_45 : f32 to vector<32x17xf32>
    %105 = tpu.concatenate %103, %104 in 1 : vector<32x239xf32>, vector<32x17xf32> -> vector<32x256xf32>
    %106 = vector.broadcast %102 : vector<1x256xf32> to vector<32x256xf32>
    %107 = arith.mulf %105, %106 : vector<32x256xf32>
    %c256 = arith.constant 256 : index
    %c0_46 = arith.constant 0 : index
    %108 = vector.load %arg9[%c256, %c0_46] : memref<324x256xf32, #tpu.memory_space<vmem>>, vector<32x256xf32>
    tpu.vector_store %arg9[%c256, %c0_46], %107 {strides = array<i32>} : memref<324x256xf32, #tpu.memory_space<vmem>>, vector<32x256xf32>,
    %109 = vector.extract_strided_slice %1 {offsets = [0, 17], sizes = [4, 239], strides = [1, 1]} : vector<4x256xf32> to vector<4x239xf32>
    %cst_47 = arith.constant 0.000000e+00 : f32
    %110 = vector.broadcast %cst_47 : f32 to vector<4x17xf32>
    %111 = tpu.concatenate %109, %110 in 1 : vector<4x239xf32>, vector<4x17xf32> -> vector<4x256xf32>
    %112 = vector.broadcast %102 : vector<1x256xf32> to vector<4x256xf32>
    %113 = arith.mulf %111, %112 : vector<4x256xf32>
    %c320 = arith.constant 320 : index
    %c0_48 = arith.constant 0 : index
    %114 = vector.load %arg9[%c320, %c0_48] : memref<324x256xf32, #tpu.memory_space<vmem>>, vector<4x256xf32>
    tpu.vector_store %arg9[%c320, %c0_48], %113 {strides = array<i32>} : memref<324x256xf32, #tpu.memory_space<vmem>>, vector<4x256xf32>,
    %c0_49 = arith.constant 0 : index
    %c0_50 = arith.constant 0 : index
    %115 = vector.load %arg5[%c0_49, %c0_50] : memref<128x324xf32, #tpu.memory_space<vmem>>, vector<128x324xf32>
    %c0_51 = arith.constant 0 : index
    %c0_52 = arith.constant 0 : index
    %116 = vector.load %arg9[%c0_51, %c0_52] : memref<324x256xf32, #tpu.memory_space<vmem>>, vector<324x256xf32>
    %cst_53 = arith.constant dense<0.000000e+00> : vector<128x256xf32>
    %117 = tpu.matmul %115, %116, %cst_53 {dimension_numbers = #tpu.dot_dimension_numbers<[1], [0], [0], [1], [0, 0, 1, 1], [], []>} : vector<128x324xf32>, vector<324x256xf32>, vector<128x256xf32> -> vector<128x256xf32>
    %c0_54 = arith.constant 0 : index
    %c0_55 = arith.constant 0 : index
    %118 = vector.load %arg10[%c0_54, %c0_55] : memref<128x256xf32, #tpu.memory_space<vmem>>, vector<128x256xf32>
    tpu.vector_store %arg10[%c0_54, %c0_55], %117 {strides = array<i32>} : memref<128x256xf32, #tpu.memory_space<vmem>>, vector<128x256xf32>,
    %c0_56 = arith.constant 0 : index
    %c0_57 = arith.constant 0 : index
    %119 = vector.load %arg10[%c0_56, %c0_57] : memref<128x256xf32, #tpu.memory_space<vmem>>, vector<32x256xf32>
    %c0_58 = arith.constant 0 : index
    %c0_59 = arith.constant 0 : index
    %120 = vector.load %arg6[%c0_58, %c0_59] : memref<128x1xf32, #tpu.memory_space<vmem>>, vector<32x1xf32>
    %121 = vector.broadcast %120 : vector<32x1xf32> to vector<32x256xf32>
    %122 = arith.addf %119, %121 : vector<32x256xf32>
    %cst_60 = arith.constant 5.000000e-01 : f32
    %123 = vector.broadcast %cst_60 : f32 to vector<32x256xf32>
    %124 = arith.mulf %123, %122 : vector<32x256xf32>
    %125 = math.tanh %124 : vector<32x256xf32>
    %cst_61 = arith.constant 5.000000e-01 : f32
    %126 = vector.broadcast %cst_61 : f32 to vector<32x256xf32>
    %127 = arith.mulf %126, %125 : vector<32x256xf32>
    %cst_62 = arith.constant 5.000000e-01 : f32
    %128 = vector.broadcast %cst_62 : f32 to vector<32x256xf32>
    %129 = arith.addf %127, %128 : vector<32x256xf32>
    %c32_63 = arith.constant 32 : index
    %c0_64 = arith.constant 0 : index
    %130 = vector.load %arg10[%c32_63, %c0_64] : memref<128x256xf32, #tpu.memory_space<vmem>>, vector<32x256xf32>
    %c32_65 = arith.constant 32 : index
    %c0_66 = arith.constant 0 : index
    %131 = vector.load %arg6[%c32_65, %c0_66] : memref<128x1xf32, #tpu.memory_space<vmem>>, vector<32x1xf32>
    %132 = vector.broadcast %131 : vector<32x1xf32> to vector<32x256xf32>
    %133 = arith.addf %130, %132 : vector<32x256xf32>
    %cst_67 = arith.constant 5.000000e-01 : f32
    %134 = vector.broadcast %cst_67 : f32 to vector<32x256xf32>
    %135 = arith.mulf %134, %133 : vector<32x256xf32>
    %136 = math.tanh %135 : vector<32x256xf32>
    %cst_68 = arith.constant 5.000000e-01 : f32
    %137 = vector.broadcast %cst_68 : f32 to vector<32x256xf32>
    %138 = arith.mulf %137, %136 : vector<32x256xf32>
    %cst_69 = arith.constant 5.000000e-01 : f32
    %139 = vector.broadcast %cst_69 : f32 to vector<32x256xf32>
    %140 = arith.addf %138, %139 : vector<32x256xf32>
    %c64_70 = arith.constant 64 : index
    %c0_71 = arith.constant 0 : index
    %141 = vector.load %arg10[%c64_70, %c0_71] : memref<128x256xf32, #tpu.memory_space<vmem>>, vector<32x256xf32>
    %c64_72 = arith.constant 64 : index
    %c0_73 = arith.constant 0 : index
    %142 = vector.load %arg6[%c64_72, %c0_73] : memref<128x1xf32, #tpu.memory_space<vmem>>, vector<32x1xf32>
    %143 = vector.broadcast %142 : vector<32x1xf32> to vector<32x256xf32>
    %144 = arith.addf %141, %143 : vector<32x256xf32>
    %cst_74 = arith.constant 5.000000e-01 : f32
    %145 = vector.broadcast %cst_74 : f32 to vector<32x256xf32>
    %146 = arith.mulf %145, %144 : vector<32x256xf32>
    %147 = math.tanh %146 : vector<32x256xf32>
    %cst_75 = arith.constant 5.000000e-01 : f32
    %148 = vector.broadcast %cst_75 : f32 to vector<32x256xf32>
    %149 = arith.mulf %148, %147 : vector<32x256xf32>
    %cst_76 = arith.constant 5.000000e-01 : f32
    %150 = vector.broadcast %cst_76 : f32 to vector<32x256xf32>
    %151 = arith.addf %149, %150 : vector<32x256xf32>
    %c96_77 = arith.constant 96 : index
    %c0_78 = arith.constant 0 : index
    %152 = vector.load %arg10[%c96_77, %c0_78] : memref<128x256xf32, #tpu.memory_space<vmem>>, vector<32x256xf32>
    %c96_79 = arith.constant 96 : index
    %c0_80 = arith.constant 0 : index
    %153 = vector.load %arg6[%c96_79, %c0_80] : memref<128x1xf32, #tpu.memory_space<vmem>>, vector<32x1xf32>
    %154 = vector.broadcast %153 : vector<32x1xf32> to vector<32x256xf32>
    %155 = arith.addf %152, %154 : vector<32x256xf32>
    %156 = math.tanh %155 : vector<32x256xf32>
    %c0_81 = arith.constant 0 : index
    %c0_82 = arith.constant 0 : index
    %c0_83 = arith.constant 0 : index
    %157 = vector.load %arg4[%c0_81, %c0_82, %c0_83] : memref<1x32x256xf32, #tpu.memory_space<vmem>>, vector<1x32x256xf32>
    %158 = vector.shape_cast %157 : vector<1x32x256xf32> to vector<32x256xf32>
    %159 = arith.mulf %140, %158 : vector<32x256xf32>
    %160 = arith.mulf %129, %156 : vector<32x256xf32>
    %161 = arith.addf %159, %160 : vector<32x256xf32>
    %162 = math.tanh %161 : vector<32x256xf32>
    %163 = arith.mulf %151, %162 : vector<32x256xf32>
    %c0_84 = arith.constant 0 : index
    %c0_85 = arith.constant 0 : index
    %c0_86 = arith.constant 0 : index
    %164 = vector.load %arg8[%c0_84, %c0_85, %c0_86] : memref<1x32x256xf32, #tpu.memory_space<vmem>>, vector<1x32x256xf32>
    %165 = vector.shape_cast %164 : vector<1x32x256xf32> to vector<32x256xf32>
    %166 = vector.shape_cast %161 : vector<32x256xf32> to vector<1x32x256xf32>
    tpu.vector_store %arg8[%c0_84, %c0_85, %c0_86], %166 {strides = array<i32>} : memref<1x32x256xf32, #tpu.memory_space<vmem>>, vector<1x32x256xf32>,
    %c0_87 = arith.constant 0 : index
    %c0_88 = arith.constant 0 : index
    %c0_89 = arith.constant 0 : index
    %167 = vector.load %arg7[%c0_87, %c0_88, %c0_89] : memref<1x32x256xf32, #tpu.memory_space<vmem>>, vector<1x32x256xf32>
    %168 = vector.shape_cast %167 : vector<1x32x256xf32> to vector<32x256xf32>
    %169 = vector.shape_cast %163 : vector<32x256xf32> to vector<1x32x256xf32>
    tpu.vector_store %arg7[%c0_87, %c0_88, %c0_89], %169 {strides = array<i32>} : memref<1x32x256xf32, #tpu.memory_space<vmem>>, vector<1x32x256xf32>,
    return
  }
  func.func @transform_0(%arg0: i32) -> (i32, i32) {
    %c0_i32 = arith.constant 0 : i32
    %c0_i32_0 = arith.constant 0 : i32
    %c0_i32_1 = arith.constant 0 : i32
    return %c0_i32, %c0_i32_0 : i32, i32
  }
  func.func @transform_1(%arg0: i32) -> (i32, i32, i32) {
    %c0_i32 = arith.constant 0 : i32
    %c0_i32_0 = arith.constant 0 : i32
    %c0_i32_1 = arith.constant 0 : i32
    return %arg0, %c0_i32, %c0_i32_0 : i32, i32, i32
  }
  func.func @transform_2(%arg0: i32) -> (i32, i32, i32) {
    %c0_i32 = arith.constant 0 : i32
    %c0_i32_0 = arith.constant 0 : i32
    %c0_i32_1 = arith.constant 0 : i32
    return %arg0, %c0_i32, %c0_i32_0 : i32, i32, i32
  }
  func.func @transform_3(%arg0: i32) -> (i32, i32, i32) {
    %c0_i32 = arith.constant 0 : i32
    %c0_i32_0 = arith.constant 0 : i32
    %c0_i32_1 = arith.constant 0 : i32
    return %arg0, %c0_i32, %c0_i32_0 : i32, i32, i32
  }
  func.func @transform_4(%arg0: i32) -> (i32, i32) {
    %c0_i32 = arith.constant 0 : i32
    %c0_i32_0 = arith.constant 0 : i32
    %c0_i32_1 = arith.constant 0 : i32
    return %c0_i32, %c0_i32_0 : i32, i32
  }
  func.func @transform_5(%arg0: i32) -> (i32, i32) {
    %c0_i32 = arith.constant 0 : i32
    %c0_i32_0 = arith.constant 0 : i32
    %c0_i32_1 = arith.constant 0 : i32
    return %c0_i32, %c0_i32_0 : i32, i32
  }
  func.func @transform_6(%arg0: i32) -> (i32, i32, i32) {
    %c0_i32 = arith.constant 0 : i32
    %c0_i32_0 = arith.constant 0 : i32
    %c0_i32_1 = arith.constant 0 : i32
    return %arg0, %c0_i32, %c0_i32_0 : i32, i32, i32
  }
  func.func @transform_7(%arg0: i32) -> (i32, i32, i32) {
    %c0_i32 = arith.constant 0 : i32
    %c0_i32_0 = arith.constant 0 : i32
    %c0_i32_1 = arith.constant 0 : i32
    return %arg0, %c0_i32, %c0_i32_0 : i32, i32, i32
  }
}

</mosaic_0001>

<bundles_post_ra>
// kernel: conv_lstm_step.1
= control target key start
LH: loop header
LB: loop body
LE: loop exit
PB: predicated region body
PF: predicated region fallthrough
CT: control target
= control target key end

     0   :  { %s2302_s24 = smov 0   ;;  %s3141_s0 = inlined_call_operand.vmem [shape: f32[9,256], index: 0, kind: input, shape index: {}]   ;;  %s3142_s1 = inlined_call_operand.vmem [shape: f32[2,4,256], index: 1, kind: input, shape index: {}]   ;;  %s3143_s2 = inlined_call_operand.vmem [shape: f32[2,32,256], index: 2, kind: input, shape index: {}]   ;;  %s3144_s3 = inlined_call_operand.vmem [shape: f32[2,32,256], index: 3, kind: input, shape index: {}]   ;;  %s3145_s4 = inlined_call_operand.vmem [shape: f32[128,324], index: 4, kind: input, shape index: {}]   ;;  %s3146_s5 = inlined_call_operand.vmem [shape: f32[128,1], index: 5, kind: input, shape index: {}]   ;;  %s3147_s6 = inlined_call_operand.vmem [shape: f32[2,32,256], index: 6, kind: output, shape index: {0}]   ;;  %s3148_s7 = inlined_call_operand.vmem [shape: f32[2,32,256], index: 7, kind: output, shape index: {1}]  }
   0x1 LB: > { %s1983_s25 = sadd.s32 4294967295, %s2250_s24   ;;  %p1987_p0 = scmp.ge.s32.totalorder %s2250_s24, 1  ;;  %s2250_s24 = sphi %s2302_s24, %s18_s24  }
   0x2   : > { %p260_p1 = scmp.lt.s32.totalorder %s2250_s24, 3 }
   0x4   : > { %p261_p2 = pnand %p1987_p0, %p260_p1 }
   0x5   : > { %p307_p3 = scmp.lt.s32.totalorder (!%p261_p2), %s1983_s25, 1  ;;  %s2252_s30 = smov (!%p261_p2), 17   ;;  %v384_v8 = vlaneseq (!%p261_p2)  ;;  %v2001_v12 = vld [vmem:[%s3141_s0 + $0x4] ss:$8 sm:$0x3] (!%p261_p2)  ;;  %vm366_vm0 = vcmask (!%p261_p2), 138240  }
   0x6   : > { %264 = sbr.rel (%p261_p2) target bundleno = 607 (0x25f), region = 44  ;;  %s2253_s8 = smov (!%p261_p2), 16   ;;  %v341_v29 = vld [vmem:[%s3141_s0] ss:$8 sm:$0x3] (!%p261_p2)  ;;  %vm442_vm1 = vcmask (!%p261_p2), 130048  }
   0x7   : > { %s2254_s9 = smov (!%p261_p2), 15   ;;  %v385_v9 = vshrl.u32 (!%p261_p2), %v384_v8, 7  ;;  %s2255_s10 = smov (!%p261_p2), 1   ;;  %v1998_v54 = vld [vmem:[%s3141_s0 + $0x1] ss:$8 sm:$0x3] (!%p261_p2) }
   0x8   : > { %s2256_s13 = smov (!%p261_p2), 127   ;;  %s2257_s14 = smov (!%p261_p2), 111   ;;  %vm522_vm2 = vcmask (!%p261_p2), 121856   ;;  %vm596_vm3 = vcmask (!%p261_p2), 7168   ;;  %vm713_vm4 = vcmask (!%p261_p2), 1039360   ;;  %vm947_vm5 = vcmask (!%p261_p2), 908288  }
   0x9   : > { %v2387_v10 = vsub.s32 (!%p261_p2), 0, %v385_v9  ;;  %v2389_v11 = vsub.s32 (!%p261_p2), 1, %v385_v9  ;;  %s2258_s15 = smov (!%p261_p2), 113   ;;  %vm793_vm6 = vcmask (!%p261_p2), 924672   ;;  %vm867_vm7 = vcmask (!%p261_p2), 916480  }
   0xa   : > { %vm1182_vm8 = vcmask (!%p261_p2), 1043456   ;;  %vm1133_vm9 = vcmask (!%p261_p2), 556032  }
   0xb   : > { %v2399_v13 = vrot.slane (!%p261_p2), %v2001_v12, %v2389_v11  ;;  %v2402_v14 = vrot.slane (!%p261_p2), %v2001_v12, %v2387_v10  ;;  %v2518_v30 = vrot.slane (!%p261_p2), %v341_v29, %v2387_v10  ;;  %v2531_v38 = vrot.slane (!%p261_p2), %v341_v29, %v2389_v11 }
   0xc   : > { %v2556_v60 = vrot.slane (!%p261_p2), %v1998_v54, %v2387_v10  ;;  %v2565_v63 = vrot.slane (!%p261_p2), %v1998_v54, %v2389_v11 }
   0xd   : > { %s3150_s25 = smov (!%p307_p3, %s1983_s25), 1  ;;  %v687_v35 = vcombine.low %v2402_v14, %v2399_v13 }
   0xe   : > { %s2313_s26 = sshll.u32 %s3150_s25, 6  ;;  %s2026_s16 = sshll.u32 %s3150_s25, 3 }
   0xf   : > { %s316_s29 = scalar_lea.vmem %s3143_s2, %s2313_s26  ;;  %s311_s19 = scalar_lea.vmem %s3142_s1, %s2026_s16 }
  0x10   : > { %v2319_v0 = vld [vmem:[%s316_s29 + $0x10] sm:$0xff]  ;;  %v2321_v1 = vld [vmem:[%s316_s29] sm:$0xff]  ;;  %v2327_v2 = vld [vmem:[%s316_s29 + $0x18] sm:$0xff]  ;;  %s2259_s25 = smov 112   ;;  %s3073_s20 = scalar_lea.vmem %s3144_s3, %s2313_s26 }
  0x11   : > { %354 = vrot.lane.b32.xlu1 %v2319_v0, %s2252_s30  ;;  %350 = vrot.lane.b32.xlu0 %v2321_v1, %s2252_s30  ;;  %v2329_v3 = vld [vmem:[%s316_s29 + $0x8] sm:$0xff]  ;;  %v2337_v5 = vld [vmem:[%s316_s29 + $0x20] sm:$0xff]  ;;  %v2410_v16 = vmul.f32 %v2399_v13, %v2327_v2  ;;  %v2414_v17 = vmul.f32 %v2402_v14, %v2321_v1  ;;  %v2418_v18 = vmul.f32 %v2402_v14, %v2319_v0  ;;  %s3102_s23 = scalar_lea.vmem %s3148_s7, %s2313_s26  ;;  %s3126_s28 = scalar_lea.vmem %s3147_s6, %s2313_s26 }
  0x12   : > { %v2335_v4 = vld [vmem:[%s316_s29 + $0x28] sm:$0xff]  ;;  %v2343_v6 = vld [vmem:[%s316_s29 + $0x38] sm:$0xff]  ;;  %v2345_v7 = vld [vmem:[%s316_s29 + $0x30] sm:$0xff]  ;;  %v2406_v15 = vmul.f32 %v2399_v13, %v2329_v3  ;;  %v2438_v23 = vmul.f32 %v2402_v14, %v2337_v5 }
  0x13   : > { %v2065_v20 = vpack.c.bf16 %v2418_v18, %v2414_v17  ;;  %v2430_v21 = vmul.f32 %v2399_v13, %v2335_v4  ;;  %v2434_v22 = vmul.f32 %v2399_v13, %v2343_v6  ;;  %v2442_v24 = vmul.f32 %v2402_v14, %v2345_v7  ;;  %v2492_v27 = vld [vmem:[%s311_s19] sm:$0xff]  ;;  %v2005_v17 = vld [vmem:[%s3141_s0 + $0x10] ss:$8 sm:$0x3] }
  0x14   : > { %v2063_v19 = vpack.c.bf16 %v2410_v16, %v2406_v15  ;;  %v2500_v28 = vcombine.high %v2492_v27, %v2492_v27  ;;  %v689_v39 = vmul.f32 %v687_v35, %v2492_v27 }
  0x15   : > { %356 = vrot.lane.b32.xlu1 %v2327_v2, %s2252_s30  ;;  %352 = vrot.lane.b32.xlu0 %v2329_v3, %s2252_s30  ;;  %v2067_v25 = vpack.c.bf16 %v2434_v22, %v2430_v21  ;;  %v2069_v26 = vpack.c.bf16 %v2442_v24, %v2438_v23 }
  0x16   : > { %v691_v44 = vcombine.high %v689_v39, %v689_v39  ;;  %693 = vst [vmem:[#allocation2 + $0x260] sm:$0xf] %v689_v39 }
  0x18   : > { %694 = vst [vmem:[#allocation2 + $0x268] sm:$0xf] %v691_v44 }
  0x19   : > { %360 = vrot.lane.b32.xlu1 %v2335_v4, %s2252_s30  ;;  %358 = vrot.lane.b32.xlu0 %v2337_v5, %s2252_s30 }
  0x1d   : > { %364 = vrot.lane.b32.xlu1 %v2343_v6, %s2252_s30  ;;  %362 = vrot.lane.b32.xlu0 %v2345_v7, %s2252_s30 }
  0x21   : > { %428 = vrot.lane.b32.xlu1 %v2329_v3, %s2253_s8  ;;  %426 = vrot.lane.b32.xlu0 %v2321_v1, %s2253_s8 }
  0x25   : > { %432 = vrot.lane.b32.xlu1 %v2327_v2, %s2253_s8  ;;  %430 = vrot.lane.b32.xlu0 %v2319_v0, %s2253_s8 }
  0x29   : > { %436 = vrot.lane.b32.xlu1 %v2335_v4, %s2253_s8  ;;  %434 = vrot.lane.b32.xlu0 %v2337_v5, %s2253_s8 }
  0x2d   : > { %440 = vrot.lane.b32.xlu1 %v2343_v6, %s2253_s8  ;;  %438 = vrot.lane.b32.xlu0 %v2345_v7, %s2253_s8 }
  0x31   : > { %508 = vrot.lane.b32.xlu1 %v2329_v3, %s2254_s9  ;;  %506 = vrot.lane.b32.xlu0 %v2321_v1, %s2254_s9 }
  0x35   : > { %512 = vrot.lane.b32.xlu1 %v2327_v2, %s2254_s9  ;;  %510 = vrot.lane.b32.xlu0 %v2319_v0, %s2254_s9 }
  0x39   : > { %516 = vrot.lane.b32.xlu1 %v2335_v4, %s2254_s9  ;;  %514 = vrot.lane.b32.xlu0 %v2337_v5, %s2254_s9 }
  0x3d   : > { %520 = vrot.lane.b32.xlu1 %v2343_v6, %s2254_s9  ;;  %518 = vrot.lane.b32.xlu0 %v2345_v7, %s2254_s9 }
  0x41   : > { %582 = vrot.lane.b32.xlu1 %v2329_v3, %s2255_s10  ;;  %580 = vrot.lane.b32.xlu0 %v2321_v1, %s2255_s10 }
  0x45   : > { %586 = vrot.lane.b32.xlu1 %v2327_v2, %s2255_s10  ;;  %584 = vrot.lane.b32.xlu0 %v2319_v0, %s2255_s10 }
  0x49   : > { %590 = vrot.lane.b32.xlu1 %v2335_v4, %s2255_s10  ;;  %588 = vrot.lane.b32.xlu0 %v2337_v5, %s2255_s10 }
  0x4d   : > { %594 = vrot.lane.b32.xlu1 %v2343_v6, %s2255_s10  ;;  %592 = vrot.lane.b32.xlu0 %v2345_v7, %s2255_s10 }
  0x51   : > { %703 = vrot.lane.b32.xlu1 %v2327_v2, %s2256_s13  ;;  %699 = vrot.lane.b32.xlu0 %v2329_v3, %s2256_s13 }
  0x55   : > { %701 = vrot.lane.b32.xlu1 %v2319_v0, %s2256_s13  ;;  %697 = vrot.lane.b32.xlu0 %v2321_v1, %s2256_s13 }
  0x59   : > { %711 = vrot.lane.b32.xlu1 %v2343_v6, %s2256_s13  ;;  %707 = vrot.lane.b32.xlu0 %v2335_v4, %s2256_s13 }
  0x5d   : > { %709 = vrot.lane.b32.xlu1 %v2345_v7, %s2256_s13  ;;  %705 = vrot.lane.b32.xlu0 %v2337_v5, %s2256_s13 }
  0x61   : > { %937 = vrot.lane.b32.xlu1 %v2327_v2, %s2257_s14  ;;  %933 = vrot.lane.b32.xlu0 %v2329_v3, %s2257_s14 }
  0x65   : > { %935 = vrot.lane.b32.xlu1 %v2319_v0, %s2257_s14  ;;  %931 = vrot.lane.b32.xlu0 %v2321_v1, %s2257_s14 }
  0x69   : > { %783 = vrot.lane.b32.xlu1 %v2327_v2, %s2258_s15  ;;  %779 = vrot.lane.b32.xlu0 %v2329_v3, %s2258_s15 }
  0x6d   : > { %781 = vrot.lane.b32.xlu1 %v2319_v0, %s2258_s15  ;;  %777 = vrot.lane.b32.xlu0 %v2321_v1, %s2258_s15 }
  0x71   : > { %945 = vrot.lane.b32.xlu1 %v2343_v6, %s2257_s14  ;;  %941 = vrot.lane.b32.xlu0 %v2335_v4, %s2257_s14 }
  0x75   : > { %943 = vrot.lane.b32.xlu1 %v2345_v7, %s2257_s14  ;;  %939 = vrot.lane.b32.xlu0 %v2337_v5, %s2257_s14 }
  0x79   : > { %486 = vrot.lane.b32.xlu0 %v2492_v27, %s2253_s8  ;;  %488 = vrot.lane.b32.xlu1 %v2500_v28, %s2253_s8 }
  0x7d   : > { %640 = vrot.lane.b32.xlu0 %v2492_v27, %s2255_s10  ;;  %642 = vrot.lane.b32.xlu1 %v2500_v28, %s2255_s10 }
  0x81   : > { %787 = vrot.lane.b32.xlu0 %v2335_v4, %s2258_s15  ;;  %791 = vrot.lane.b32.xlu1 %v2343_v6, %s2258_s15 }
  0x83   : > { %v355_v31 = vpop.permute.xlu1 %354  ;;  %v351_v32 = vpop.permute.xlu0 %350 }
  0x84   : > { %v380_v33 = vsel %vm366_vm0, 0.0, %v355_v31  ;;  %v379_v34 = vsel %vm366_vm0, 0.0, %v351_v32 }
  0x85   : > { %v396_v36 = vmul.f32 %v2518_v30, %v380_v33  ;;  %v394_v37 = vmul.f32 %v2518_v30, %v379_v34  ;;  %785 = vrot.lane.b32.xlu0 %v2337_v5, %s2258_s15  ;;  %789 = vrot.lane.b32.xlu1 %v2345_v7, %s2258_s15 }
  0x87   : > { %v357_v40 = vpop.permute.xlu1 %356  ;;  %v353_v41 = vpop.permute.xlu0 %352  ;;  %v2033_v55 = vpack.c.bf16 %v396_v36, %v394_v37 }
  0x88   : > { %v368_v42 = vsel %vm366_vm0, %v355_v31, %v357_v40  ;;  %v367_v43 = vsel %vm366_vm0, %v351_v32, %v353_v41 }
  0x89   : > { %v397_v45 = vmul.f32 %v2531_v38, %v368_v42  ;;  %v395_v46 = vmul.f32 %v2531_v38, %v367_v43  ;;  %412 = vrot.lane.b32.xlu0 %v2492_v27, %s2252_s30  ;;  %414 = vrot.lane.b32.xlu1 %v2500_v28, %s2252_s30 }
  0x8b   : > { %v361_v47 = vpop.permute.xlu1 %360  ;;  %v359_v48 = vpop.permute.xlu0 %358  ;;  %v2031_v49 = vpack.c.bf16 %v397_v45, %v395_v46 }
  0x8c   : > { %v369_v50 = vsel %vm366_vm0, %v359_v48, %v361_v47  ;;  %v381_v51 = vsel %vm366_vm0, 0.0, %v359_v48 }
  0x8d   : > { %v398_v52 = vmul.f32 %v2518_v30, %v381_v51  ;;  %v399_v53 = vmul.f32 %v2531_v38, %v369_v50  ;;  %566 = vrot.lane.b32.xlu0 %v2492_v27, %s2254_s9  ;;  %568 = vrot.lane.b32.xlu1 %v2500_v28, %s2254_s9 }
  0x8e   : > { %2032 = vmatprep.subr.bf16.mxu1 %v2031_v49 }
  0x8f   : > { %v365_v56 = vpop.permute.xlu1 %364  ;;  %v363_v57 = vpop.permute.xlu0 %362  ;;  %2034 = vmatpush1.bf16.msra.mxu1 %v2033_v55 }
  0x90   : > { %v370_v58 = vsel %vm366_vm0, %v363_v57, %v365_v56  ;;  %v382_v59 = vsel %vm366_vm0, 0.0, %v363_v57  ;;  %v1004_v57 = vld [vmem:[%s3145_s4 + $0x8] sm:$0xff] }
  0x91   : > { %v400_v61 = vmul.f32 %v2518_v30, %v382_v59  ;;  %v401_v62 = vmul.f32 %v2531_v38, %v370_v58  ;;  %759 = vrot.lane.b32.xlu0 %v2500_v28, %s2256_s13  ;;  %853 = vrot.lane.b32.xlu1 %v2329_v3, %s2259_s25 }
  0x92   : > { %1253 = vmatprep.mubr.f32.mxu1 %v1004_v57 }
  0x93   : > { %v429_v8 = vpop.permute.xlu1 %428  ;;  %v427_v9 = vpop.permute.xlu0 %426  ;;  %v2035_v12 = vpack.c.bf16 %v401_v62, %v399_v53  ;;  %v2037_v13 = vpack.c.bf16 %v400_v61, %v398_v52 }
  0x94   : > { %v443_v14 = vsel %vm442_vm1, %v427_v9, %v429_v8  ;;  %v455_v29 = vsel %vm442_vm1, 0.0, %v427_v9 }
  0x95   : > { %v470_v31 = vmul.f32 %v2556_v60, %v455_v29  ;;  %v471_v32 = vmul.f32 %v2565_v63, %v443_v14  ;;  %857 = vrot.lane.b32.xlu0 %v2327_v2, %s2259_s25  ;;  %913 = vrot.lane.b32.xlu1 %v2500_v28, %s2259_s25 }
  0x96   : > { %2036 = vmatprep.subr.bf16.mxu1 %v2035_v12 }
  0x97   : > { %v433_v3 = vpop.permute.xlu1 %432  ;;  %v431_v33 = vpop.permute.xlu0 %430  ;;  %2038 = vmatpush1.bf16.msra.mxu1 %v2037_v13 }
  0x98   : > { %v444_v34 = vsel %vm442_vm1, %v431_v33, %v433_v3  ;;  %v456_v35 = vsel %vm442_vm1, 0.0, %v431_v33 }
  0x99   : > { %v472_v36 = vmul.f32 %v2556_v60, %v456_v35  ;;  %v473_v37 = vmul.f32 %v2565_v63, %v444_v34  ;;  %757 = vrot.lane.b32.xlu0 %v2492_v27, %s2256_s13  ;;  %851 = vrot.lane.b32.xlu1 %v2321_v1, %s2259_s25  ;;  %v1999_v1 = vld [vmem:[%s3141_s0 + $0x2] ss:$8 sm:$0x3] }
  0x9a   : > { %v2597_v50 = vrot.slane %v1999_v1, %v2387_v10  ;;  %v2606_v52 = vrot.slane %v1999_v1, %v2389_v11 }
  0x9b   : > { %v437_v2 = vpop.permute.xlu1 %436  ;;  %v435_v39 = vpop.permute.xlu0 %434  ;;  %v2039_v40 = vpack.c.bf16 %v473_v37, %v471_v32  ;;  %v2041_v41 = vpack.c.bf16 %v472_v36, %v470_v31 }
  0x9c   : > { %v445_v42 = vsel %vm442_vm1, %v435_v39, %v437_v2  ;;  %v457_v43 = vsel %vm442_vm1, 0.0, %v435_v39 }
  0x9d   : > { %v474_v44 = vmul.f32 %v2556_v60, %v457_v43  ;;  %v475_v45 = vmul.f32 %v2565_v63, %v445_v42  ;;  %855 = vrot.lane.b32.xlu0 %v2319_v0, %s2259_s25  ;;  %911 = vrot.lane.b32.xlu1 %v2492_v27, %s2259_s25 }
  0x9e   : > { %2040 = vmatprep.subr.bf16.mxu1 %v2039_v40 }
  0x9f   : > { %v441_v46 = vpop.permute.xlu1 %440  ;;  %v439_v47 = vpop.permute.xlu0 %438  ;;  %2042 = vmatpush1.bf16.msra.mxu1 %v2041_v41 }
  0xa0   : > { %v446_v48 = vsel %vm442_vm1, %v439_v47, %v441_v46  ;;  %v458_v49 = vsel %vm442_vm1, 0.0, %v439_v47 }
  0xa1   : > { %v476_v0 = vmul.f32 %v2556_v60, %v458_v49  ;;  %v477_v51 = vmul.f32 %v2565_v63, %v446_v48  ;;  %839 = vrot.lane.b32.xlu0 %v2500_v28, %s2258_s15  ;;  %837 = vrot.lane.b32.xlu1 %v2492_v27, %s2258_s15 }
  0xa3   : > { %v509_v53 = vpop.permute.xlu1 %508  ;;  %v507_v54 = vpop.permute.xlu0 %506  ;;  %v2043_v55 = vpack.c.bf16 %v477_v51, %v475_v45  ;;  %v2045_v56 = vpack.c.bf16 %v476_v0, %v474_v44 }
  0xa4   : > { %v523_v58 = vsel %vm522_vm2, %v507_v54, %v509_v53  ;;  %v535_v59 = vsel %vm522_vm2, 0.0, %v507_v54 }
  0xa5   : > { %v550_v61 = vmul.f32 %v2597_v50, %v535_v59  ;;  %v551_v62 = vmul.f32 %v2606_v52, %v523_v58  ;;  %861 = vrot.lane.b32.xlu0 %v2335_v4, %s2259_s25  ;;  %865 = vrot.lane.b32.xlu1 %v2343_v6, %s2259_s25 }
  0xa6   : > { %2044 = vmatprep.subr.bf16.mxu1 %v2043_v55 }
  0xa7   : > { %v513_v8 = vpop.permute.xlu1 %512  ;;  %v511_v9 = vpop.permute.xlu0 %510  ;;  %2046 = vmatpush1.bf16.msra.mxu1 %v2045_v56 }
  0xa8   : > { %v524_v12 = vsel %vm522_vm2, %v511_v9, %v513_v8  ;;  %v536_v13 = vsel %vm522_vm2, 0.0, %v511_v9 }
  0xa9   : > { %v552_v14 = vmul.f32 %v2597_v50, %v536_v13  ;;  %v553_v29 = vmul.f32 %v2606_v52, %v524_v12  ;;  %859 = vrot.lane.b32.xlu0 %v2337_v5, %s2259_s25  ;;  %863 = vrot.lane.b32.xlu1 %v2345_v7, %s2259_s25  ;;  %v2000_v5 = vld [vmem:[%s3141_s0 + $0x3] ss:$8 sm:$0x3]  ;;  %v2260_v7 = vmov 0.0  }
  0xaa   : > { %1414 = vmatprep.mubr.f32.mxu0 %v2260_v7  ;;  %v2644_v40 = vrot.slane %v2000_v5, %v2387_v10  ;;  %v2647_v41 = vrot.slane %v2000_v5, %v2389_v11  ;;  %v2002_v12 = vld [vmem:[%s3141_s0 + $0x5] ss:$8 sm:$0x3] }
  0xab   : > { %v517_v4 = vpop.permute.xlu1 %516  ;;  %v515_v6 = vpop.permute.xlu0 %514  ;;  %v2047_v31 = vpack.c.bf16 %v553_v29, %v551_v62  ;;  %v2049_v32 = vpack.c.bf16 %v552_v14, %v550_v61 }
  0xac   : > { %v525_v3 = vsel %vm522_vm2, %v515_v6, %v517_v4  ;;  %v537_v33 = vsel %vm522_vm2, 0.0, %v515_v6 }
  0xad   : > { %v554_v34 = vmul.f32 %v2597_v50, %v537_v33  ;;  %v555_v35 = vmul.f32 %v2606_v52, %v525_v3  ;;  %993 = vrot.lane.b32.xlu0 %v2500_v28, %s2257_s14  ;;  %991 = vrot.lane.b32.xlu1 %v2492_v27, %s2257_s14 }
  0xae   : > { %2048 = vmatprep.subr.bf16.mxu1 %v2047_v31 }
  0xaf   : > { %v521_v36 = vpop.permute.xlu1 %520  ;;  %v519_v37 = vpop.permute.xlu0 %518  ;;  %2050 = vmatpush1.bf16.msra.mxu1 %v2049_v32  ;;  %v2669_v32 = vrot.slane %v2002_v12, %v2389_v11 }
  0xb0   : > { %v526_v2 = vsel %vm522_vm2, %v519_v37, %v521_v36  ;;  %v538_v39 = vsel %vm522_vm2, 0.0, %v519_v37 }
  0xb1   : > { %v556_v28 = vmul.f32 %v2597_v50, %v538_v39  ;;  %v557_v27 = vmul.f32 %v2606_v52, %v526_v2  ;;  %v2676_v39 = vrot.slane %v2002_v12, %v2387_v10 }
  0xb3   : > { %v583_v42 = vpop.permute.xlu1 %582  ;;  %v581_v43 = vpop.permute.xlu0 %580  ;;  %v2051_v44 = vpack.c.bf16 %v557_v27, %v555_v35  ;;  %v2053_v45 = vpack.c.bf16 %v556_v28, %v554_v34 }
  0xb4   : > { %v597_v1 = vsel %vm596_vm3, %v581_v43, %v583_v42  ;;  %v609_v46 = vsel %vm596_vm3, 0.0, %v581_v43 }
  0xb5   : > { %v624_v47 = vmul.f32 %v2644_v40, %v609_v46  ;;  %v625_v48 = vmul.f32 %v2647_v41, %v597_v1  ;;  %2052 = vmatprep.subr.bf16.mxu1 %v2051_v44 }
  0xb6   : > { %2054 = vmatpush1.bf16.msra.mxu1 %v2053_v45 }
  0xb7   : > { %v587_v49 = vpop.permute.xlu1 %586  ;;  %v585_v0 = vpop.permute.xlu0 %584 }
  0xb8   : > { %v598_v51 = vsel %vm596_vm3, %v585_v0, %v587_v49  ;;  %v610_v53 = vsel %vm596_vm3, 0.0, %v585_v0 }
  0xb9   : > { %v626_v54 = vmul.f32 %v2644_v40, %v610_v53  ;;  %v627_v55 = vmul.f32 %v2647_v41, %v598_v51  ;;  %v2706_v51 = vrot.slane %v2005_v17, %v2389_v11 }
  0xbb   : > { %v591_v56 = vpop.permute.xlu1 %590  ;;  %v589_v57 = vpop.permute.xlu0 %588  ;;  %v2055_v58 = vpack.c.bf16 %v627_v55, %v625_v48  ;;  %v2057_v59 = vpack.c.bf16 %v626_v54, %v624_v47 }
  0xbc   : > { %v599_v61 = vsel %vm596_vm3, %v589_v57, %v591_v56  ;;  %v611_v62 = vsel %vm596_vm3, 0.0, %v589_v57 }
  0xbd   : > { %v628_v8 = vmul.f32 %v2644_v40, %v611_v62  ;;  %v629_v9 = vmul.f32 %v2647_v41, %v599_v61  ;;  %2056 = vmatprep.subr.bf16.mxu1 %v2055_v58  ;;  %v2713_v58 = vrot.slane %v2005_v17, %v2387_v10 }
  0xbe   : > { %2058 = vmatpush1.bf16.msra.mxu1 %v2057_v59  ;;  %v2003_v59 = vld [vmem:[%s3141_s0 + $0x6] ss:$8 sm:$0x3] }
  0xbf   : > { %v595_v13 = vpop.permute.xlu1 %594  ;;  %v593_v14 = vpop.permute.xlu0 %592 }
  0xc0   : > { %v600_v29 = vsel %vm596_vm3, %v593_v14, %v595_v13  ;;  %v612_v4 = vsel %vm596_vm3, 0.0, %v593_v14 }
  0xc1   : > { %v630_v6 = vmul.f32 %v2644_v40, %v612_v4  ;;  %v631_v31 = vmul.f32 %v2647_v41, %v600_v29  ;;  %v2723_v29 = vrot.slane %v2003_v59, %v2389_v11 }
  0xc3   : > { %v704_v3 = vpop.permute.xlu1 %703  ;;  %v700_v33 = vpop.permute.xlu0 %699  ;;  %v2059_v34 = vpack.c.bf16 %v631_v31, %v629_v9  ;;  %v2061_v35 = vpack.c.bf16 %v630_v6, %v628_v8 }
  0xc4   : > { %v727_v5 = vsel %vm713_vm4, %v704_v3, 0.0  ;;  %v726_v36 = vsel %vm713_vm4, %v700_v33, 0.0 }
  0xc5   : > { %v744_v37 = vmul.f32 %v2669_v32, %v727_v5  ;;  %v742_v2 = vmul.f32 %v2669_v32, %v726_v36  ;;  %2060 = vmatprep.subr.bf16.mxu1 %v2059_v34  ;;  %v2730_v5 = vrot.slane %v2003_v59, %v2387_v10 }
  0xc6   : > { %2062 = vmatpush1.bf16.msra.mxu1 %v2061_v35 }
  0xc7   : > { %v702_v28 = vpop.permute.xlu1 %701  ;;  %v698_v27 = vpop.permute.xlu0 %697  ;;  %2064 = vmatprep.subr.bf16.mxu1 %v2063_v19  ;;  %v2071_v48 = vpack.c.bf16 %v744_v37, %v742_v2 }
  0xc8   : > { %v715_v42 = vsel %vm713_vm4, %v702_v28, %v704_v3  ;;  %v714_v43 = vsel %vm713_vm4, %v698_v27, %v700_v33 }
  0xc9   : > { %v743_v44 = vmul.f32 %v2676_v39, %v715_v42  ;;  %v741_v45 = vmul.f32 %v2676_v39, %v714_v43 }
  0xca   : > { %2066 = vmatpush1.bf16.msra.mxu1 %v2065_v20 }
  0xcb   : > { %v712_v1 = vpop.permute.xlu1 %711  ;;  %v708_v46 = vpop.permute.xlu0 %707  ;;  %2068 = vmatprep.subr.bf16.mxu1 %v2067_v25  ;;  %v2073_v25 = vpack.c.bf16 %v743_v44, %v741_v45 }
  0xcc   : > { %v729_v15 = vsel %vm713_vm4, %v712_v1, 0.0  ;;  %v728_v16 = vsel %vm713_vm4, %v708_v46, 0.0 }
  0xcd   : > { %v748_v19 = vmul.f32 %v2669_v32, %v729_v15  ;;  %v746_v47 = vmul.f32 %v2669_v32, %v728_v16 }
  0xce   : > { %2070 = vmatpush1.bf16.msra.mxu1 %v2069_v26 }
  0xcf   : > { %v710_v18 = vpop.permute.xlu1 %709  ;;  %v706_v20 = vpop.permute.xlu0 %705  ;;  %2072 = vmatprep.subr.bf16.mxu1 %v2071_v48  ;;  %v2075_v53 = vpack.c.bf16 %v748_v19, %v746_v47 }
  0xd0   : > { %v717_v21 = vsel %vm713_vm4, %v710_v18, %v712_v1  ;;  %v716_v22 = vsel %vm713_vm4, %v706_v20, %v708_v46 }
  0xd1   : > { %v747_v49 = vmul.f32 %v2676_v39, %v717_v21  ;;  %v745_v0 = vmul.f32 %v2676_v39, %v716_v22 }
  0xd2   : > { %2074 = vmatpush1.bf16.msra.mxu1 %v2073_v25  ;;  %v1551_v25 = vld [vmem:[%s3146_s5] sm:$0xff] }
  0xd3   : > { %v938_v23 = vpop.permute.xlu1 %937  ;;  %v934_v24 = vpop.permute.xlu0 %933  ;;  %2076 = vmatprep.subr.bf16.mxu1 %v2075_v53  ;;  %v2077_v26 = vpack.c.bf16 %v747_v49, %v745_v0  ;;  %v1552_v49 = vld [vmem:[%s3146_s5 + $0x8] sm:$0xff]  ;;  %v2261_v0 = vmov 0  }
  0xd4   : > { %v961_v54 = vsel %vm947_vm5, %v938_v23, 0.0  ;;  %v960_v55 = vsel %vm947_vm5, %v934_v24, 0.0  ;;  %2161 = vset.pattern.permute.xlu0 %v2261_v0  ;;  %2162 = vset.pattern.permute.xlu1 %v2261_v0 }
  0xd5   : > { %v978_v56 = vmul.f32 %v2706_v51, %v961_v54  ;;  %v976_v57 = vmul.f32 %v2706_v51, %v960_v55  ;;  %1557 = vperm.xlu0 %2161, %v1551_v25   ;;  %1562 = vperm.xlu1 %2162, %v1552_v49   ;;  %v1553_v55 = vld [vmem:[%s3146_s5 + $0x10] sm:$0xff] }
  0xd6   : > { %2078 = vmatpush1.bf16.msra.mxu1 %v2077_v26 }
  0xd7   : > { %v936_v61 = vpop.permute.xlu1 %935  ;;  %v932_v62 = vpop.permute.xlu0 %931  ;;  %v2095_v8 = vpack.c.bf16 %v978_v56, %v976_v57  ;;  %v1554_v56 = vld [vmem:[%s3146_s5 + $0x18] sm:$0xff] }
  0xd8   : > { %v949_v9 = vsel %vm947_vm5, %v936_v61, %v938_v23  ;;  %v948_v12 = vsel %vm947_vm5, %v932_v62, %v934_v24 }
  0xd9   : > { %v977_v13 = vmul.f32 %v2713_v58, %v949_v9  ;;  %v975_v14 = vmul.f32 %v2713_v58, %v948_v12  ;;  %2096 = vmatprep.subr.bf16.mxu0 %v2095_v8  ;;  %1567 = vperm.xlu1 %2162, %v1553_v55  }
  0xda   : > { %1572 = vperm.xlu0 %2161, %v1554_v56  }
  0xdb   : > { %v784_v4 = vpop.permute.xlu1 %783  ;;  %v780_v6 = vpop.permute.xlu0 %779  ;;  %v2097_v31 = vpack.c.bf16 %v977_v13, %v975_v14  ;;  %v1623_v14 = vld [vmem:[%s3146_s5 + $0x20] sm:$0xff] }
  0xdc   : > { %v807_v3 = vsel %vm793_vm6, %v784_v4, 0.0  ;;  %v806_v33 = vsel %vm793_vm6, %v780_v6, 0.0 }
  0xdd   : > { %v824_v34 = vmul.f32 %v2723_v29, %v807_v3  ;;  %v822_v35 = vmul.f32 %v2723_v29, %v806_v33  ;;  %2098 = vmatpush1.bf16.msra.mxu0 %v2097_v31  ;;  %1629 = vperm.xlu1 %2162, %v1623_v14  }
  0xdf   : > { %v782_v36 = vpop.permute.xlu1 %781  ;;  %v778_v37 = vpop.permute.xlu0 %777  ;;  %v2079_v2 = vpack.c.bf16 %v824_v34, %v822_v35 }
  0xe0   : > { %v795_v28 = vsel %vm793_vm6, %v782_v36, %v784_v4  ;;  %v794_v27 = vsel %vm793_vm6, %v778_v37, %v780_v6  ;;  %v1625_v36 = vld [vmem:[%s3146_s5 + $0x30] sm:$0xff] }
  0xe1   : > { %v823_v42 = vmul.f32 %v2730_v5, %v795_v28  ;;  %v821_v43 = vmul.f32 %v2730_v5, %v794_v27  ;;  %2080 = vmatprep.subr.bf16.mxu1 %v2079_v2  ;;  %1639 = vperm.xlu1 %2162, %v1625_v36  }
  0xe3   : > { %v946_v44 = vpop.permute.xlu1 %945  ;;  %v942_v45 = vpop.permute.xlu0 %941  ;;  %v2081_v1 = vpack.c.bf16 %v823_v42, %v821_v43 }
  0xe4   : > { %v963_v46 = vsel %vm947_vm5, %v946_v44, 0.0  ;;  %v962_v15 = vsel %vm947_vm5, %v942_v45, 0.0 }
  0xe5   : > { %v982_v16 = vmul.f32 %v2706_v51, %v963_v46  ;;  %v980_v19 = vmul.f32 %v2706_v51, %v962_v15  ;;  %2082 = vmatpush1.bf16.msra.mxu1 %v2081_v1 }
  0xe7   : > { %v944_v47 = vpop.permute.xlu1 %943  ;;  %v940_v48 = vpop.permute.xlu0 %939  ;;  %v2099_v17 = vpack.c.bf16 %v982_v16, %v980_v19 }
  0xe8   : > { %v951_v18 = vsel %vm947_vm5, %v944_v47, %v946_v44  ;;  %v950_v20 = vsel %vm947_vm5, %v940_v48, %v942_v45  ;;  %v1767_v44 = vld [vmem:[%s3146_s5 + $0x60] sm:$0xff]  ;;  %v1768_v45 = vld [vmem:[%s3146_s5 + $0x68] sm:$0xff] }
  0xe9   : > { %v981_v21 = vmul.f32 %v2713_v58, %v951_v18  ;;  %v979_v22 = vmul.f32 %v2713_v58, %v950_v20  ;;  %2100 = vmatprep.subr.bf16.mxu0 %v2099_v17  ;;  %1773 = vperm.xlu1 %2162, %v1767_v44   ;;  %v1769_v17 = vld [vmem:[%s3146_s5 + $0x70] sm:$0xff]  ;;  %v1770_v18 = vld [vmem:[%s3146_s5 + $0x78] sm:$0xff] }
  0xeb   : > { %v487_v53 = vpop.permute.xlu0 %486  ;;  %v489_v23 = vpop.permute.xlu1 %488  ;;  %v2101_v24 = vpack.c.bf16 %v981_v21, %v979_v22  ;;  %v2004_v22 = vld [vmem:[%s3141_s0 + $0x7] ss:$8 sm:$0x3] }
  0xec   : > { %v493_v26 = vsel %vm442_vm1, 0.0, %v487_v53  ;;  %v490_v54 = vsel %vm442_vm1, %v487_v53, %v489_v23 }
  0xed   : > { %v494_v57 = vmul.f32 %v493_v26, %v2556_v60  ;;  %v495_v59 = vmul.f32 %v490_v54, %v2565_v63  ;;  %2102 = vmatpush1.bf16.msra.mxu0 %v2101_v24  ;;  %v1624_v60 = vld [vmem:[%s3146_s5 + $0x28] sm:$0xff]  ;;  %1783 = vperm.xlu1 %2162, %v1769_v17   ;;  %v2814_v26 = vrot.slane %v2004_v22, %v2389_v11 }
  0xee   : > { %1634 = vperm.xlu0 %2161, %v1624_v60   ;;  %v888_v60 = vrot.slane %v2004_v22, %v2387_v10 }
  0xef   : > { %v498_v61 = vrot.slane %v494_v57, 4  ;;  %v499_v62 = vrot.slane %v495_v59, 4  ;;  %v641_v8 = vpop.permute.xlu0 %640  ;;  %v643_v9 = vpop.permute.xlu1 %642 }
  0xf0   : > { %v647_v12 = vsel %vm596_vm3, 0.0, %v641_v8  ;;  %v644_v13 = vsel %vm596_vm3, %v641_v8, %v643_v9 }
  0xf1   : > { %502 = vst [vmem:[#allocation2 + $0x240] sm:$0xf0] %v498_v61  ;;  %503 = vst [vmem:[#allocation2 + $0x248] sm:$0xf0] %v499_v62  ;;  %v648_v63 = vmul.f32 %v647_v12, %v2644_v40  ;;  %v649_v4 = vmul.f32 %v644_v13, %v2647_v41  ;;  %v1626_v40 = vld [vmem:[%s3146_s5 + $0x38] sm:$0xff] }
  0xf2   : > { %1644 = vperm.xlu0 %2161, %v1626_v40  }
  0xf3   : > { %v652_v6 = vrot.slane %v648_v63, 4  ;;  %v653_v31 = vrot.slane %v649_v4, 4  ;;  %v788_v3 = vpop.permute.xlu0 %787  ;;  %v792_v33 = vpop.permute.xlu1 %791 }
  0xf4   : > { %v808_v34 = vsel %vm793_vm6, %v788_v3, 0.0  ;;  %v809_v35 = vsel %vm793_vm6, %v792_v33, 0.0 }
  0xf5   : > { %656 = vst [vmem:[#allocation2 + $0x250] sm:$0xf0] %v652_v6  ;;  %657 = vst [vmem:[#allocation2 + $0x258] sm:$0xf0] %v653_v31  ;;  %v826_v41 = vmul.f32 %v2723_v29, %v808_v34  ;;  %v828_v37 = vmul.f32 %v2723_v29, %v809_v35 }
  0xf6   : > { %1778 = vperm.xlu0 %2161, %v1768_v45  }
  0xf7   : > { %v786_v2 = vpop.permute.xlu0 %785  ;;  %v790_v28 = vpop.permute.xlu1 %789  ;;  %v2083_v27 = vpack.c.bf16 %v828_v37, %v826_v41 }
  0xf8   : > { %v796_v42 = vsel %vm793_vm6, %v786_v2, %v788_v3  ;;  %v797_v43 = vsel %vm793_vm6, %v790_v28, %v792_v33 }
  0xf9   : > { %v825_v1 = vmul.f32 %v2730_v5, %v796_v42  ;;  %v827_v46 = vmul.f32 %v2730_v5, %v797_v43  ;;  %2084 = vmatprep.subr.bf16.mxu1 %v2083_v27 }
  0xfa   : > { %1788 = vperm.xlu0 %2161, %v1770_v18  }
  0xfb   : > { %v413_v15 = vpop.permute.xlu0 %412  ;;  %v415_v16 = vpop.permute.xlu1 %414  ;;  %v2085_v19 = vpack.c.bf16 %v827_v46, %v825_v1 }
  0xfc   : > { %v419_v47 = vsel %vm366_vm0, 0.0, %v413_v15  ;;  %v416_v48 = vsel %vm366_vm0, %v413_v15, %v415_v16 }
  0xfd   : > { %v420_v20 = vmul.f32 %v419_v47, %v2518_v30  ;;  %v421_v21 = vmul.f32 %v416_v48, %v2531_v38  ;;  %2086 = vmatpush1.bf16.msra.mxu1 %v2085_v19  ;;  %v1695_v30 = vld [vmem:[%s3146_s5 + $0x40] sm:$0xff]  ;;  %v1696_v38 = vld [vmem:[%s3146_s5 + $0x48] sm:$0xff] }
  0xfe   : > { %1701 = vperm.xlu1 %2162, %v1695_v30   ;;  %1706 = vperm.xlu0 %2161, %v1696_v38  }
  0xff   : > { %422 = vst [vmem:[#allocation2 + $0x240] sm:$0xf] %v420_v20  ;;  %423 = vst [vmem:[#allocation2 + $0x248] sm:$0xf] %v421_v21  ;;  %v567_v25 = vpop.permute.xlu0 %566  ;;  %v569_v49 = vpop.permute.xlu1 %568 }
 0x100   : > { %v573_v0 = vsel %vm522_vm2, 0.0, %v567_v25  ;;  %v570_v53 = vsel %vm522_vm2, %v567_v25, %v569_v49 }
 0x101   : > { %v574_v23 = vmul.f32 %v573_v0, %v2597_v50  ;;  %v575_v24 = vmul.f32 %v570_v53, %v2606_v52  ;;  %v1697_v50 = vld [vmem:[%s3146_s5 + $0x50] sm:$0xff]  ;;  %v1698_v52 = vld [vmem:[%s3146_s5 + $0x58] sm:$0xff] }
 0x102   : > { %1711 = vperm.xlu1 %2162, %v1697_v50   ;;  %1716 = vperm.xlu0 %2161, %v1698_v52  }
 0x103   : > { %576 = vst [vmem:[#allocation2 + $0x250] sm:$0xf] %v574_v23  ;;  %577 = vst [vmem:[#allocation2 + $0x258] sm:$0xf] %v575_v24  ;;  %v760_v54 = vpop.permute.xlu0 %759  ;;  %v854_v55 = vpop.permute.xlu1 %853 }
 0x104   : > { %v764_v56 = vsel %vm713_vm4, %v760_v54, 0.0  ;;  %v880_v57 = vsel %vm867_vm7, %v854_v55, 0.0 }
 0x105   : > { %v766_v11 = vmul.f32 %v764_v56, %v2669_v32  ;;  %v896_v59 = vmul.f32 %v2814_v26, %v880_v57 }
 0x106   : > { %v1124_v63 = vld [vmem:[#allocation2 + $0x248] sm:$0xff]  ;;  %v1123_v4 = vld [vmem:[#allocation2 + $0x240] sm:$0xff] }
 0x107   : > { %v770_v61 = vrot.slane %v766_v11, 4  ;;  %v858_v62 = vpop.permute.xlu0 %857  ;;  %v914_v8 = vpop.permute.xlu1 %913 }
 0x108   : > { %v881_v9 = vsel %vm867_vm7, %v858_v62, 0.0  ;;  %v918_v12 = vsel %vm867_vm7, %v914_v8, 0.0 }
 0x109   : > { %774 = vst [vmem:[#allocation2 + $0x268] sm:$0xf0] %v770_v61  ;;  %v898_v13 = vmul.f32 %v2814_v26, %v881_v9  ;;  %v920_v14 = vmul.f32 %v918_v12, %v2814_v26  ;;  %v1007_v9 = vld [vmem:[%s3145_s4 + $0x20] sm:$0xff]  ;;  %v1005_v12 = vld [vmem:[%s3145_s4 + $0x10] sm:$0xff] }
 0x10a   : > { %v1126_v32 = vld [vmem:[#allocation2 + $0x258] sm:$0xff]  ;;  %v1125_v6 = vld [vmem:[#allocation2 + $0x250] sm:$0xff] }
 0x10b   : > { %v924_v31 = vrot.slane %v920_v14, 4  ;;  %v758_v3 = vpop.permute.xlu0 %757  ;;  %v852_v33 = vpop.permute.xlu1 %851  ;;  %v2103_v34 = vpack.c.bf16 %v1126_v32, %v1124_v63  ;;  %v2105_v35 = vpack.c.bf16 %v1125_v6, %v1123_v4  ;;  %v2087_v36 = vpack.c.bf16 %v898_v13, %v896_v59  ;;  %v1009_v13 = vld [vmem:[%s3145_s4 + $0x30] sm:$0xff]  ;;  %v1012_v32 = vld [vmem:[%s3145_s4 + $0x48] sm:$0xff] }
 0x10c   : > { %v761_v40 = vsel %vm713_vm4, %v758_v3, %v760_v54  ;;  %v868_v41 = vsel %vm867_vm7, %v852_v33, %v854_v55  ;;  %v1013_v63 = vld [vmem:[%s3145_s4 + $0x50] sm:$0xff]  ;;  %v1008_v4 = vld [vmem:[%s3145_s4 + $0x28] sm:$0xff]  ;;  %v1011_v3 = vld [vmem:[%s3145_s4 + $0x40] sm:$0xff] }
 0x10d   : > { %928 = vst [vmem:[#allocation2 + $0x278] sm:$0xf0] %v924_v31  ;;  %v765_v37 = vmul.f32 %v761_v40, %v2676_v39  ;;  %v895_v2 = vmul.f32 %v888_v60, %v868_v41  ;;  %2104 = vmatprep.subr.bf16.mxu0 %v2103_v34  ;;  %2088 = vmatprep.subr.bf16.mxu1 %v2087_v36  ;;  %v1016_v6 = vld [vmem:[%s3145_s4 + $0x68] sm:$0xff]  ;;  %v1015_v31 = vld [vmem:[%s3145_s4 + $0x60] sm:$0xff]  ;;  %v1018_v34 = vld [vmem:[%s3145_s4 + $0x78] sm:$0xff] }
 0x10e   : > { %2106 = vmatpush1.bf16.msra.mxu0 %v2105_v35  ;;  %v1019_v33 = vld [vmem:[%s3145_s4 + $0x80] sm:$0xff]  ;;  %v1014_v35 = vld [vmem:[%s3145_s4 + $0x58] sm:$0xff]  ;;  %v1021_v40 = vld [vmem:[%s3145_s4 + $0x90] sm:$0xff] }
 0x10f   : > { %v769_v10 = vrot.slane %v765_v37, 4  ;;  %v856_v28 = vpop.permute.xlu0 %855  ;;  %v912_v27 = vpop.permute.xlu1 %911  ;;  %v1022_v36 = vld [vmem:[%s3145_s4 + $0x98] sm:$0xff]  ;;  %v1017_v41 = vld [vmem:[%s3145_s4 + $0x70] sm:$0xff] }
 0x110   : > { %v869_v42 = vsel %vm867_vm7, %v856_v28, %v858_v62  ;;  %v915_v43 = vsel %vm867_vm7, %v912_v27, %v914_v8  ;;  %v1128_v23 = vld [vmem:[#allocation2 + $0x268] sm:$0xff]  ;;  %v1003_v8 = vld [vmem:[%s3145_s4] sm:$0xff]  ;;  %v1025_v37 = vld [vmem:[%s3145_s4 + $0xb0] sm:$0xff] }
 0x111   : > { %773 = vst [vmem:[#allocation2 + $0x260] sm:$0xf0] %v769_v10  ;;  %v897_v44 = vmul.f32 %v888_v60, %v869_v42  ;;  %v919_v45 = vmul.f32 %v915_v43, %v888_v60  ;;  %v1020_v10 = vld [vmem:[%s3145_s4 + $0x88] sm:$0xff]  ;;  %v1027_v27 = vld [vmem:[%s3145_s4 + $0xc0] sm:$0xff] }
 0x112   : > { %v1028_v28 = vld [vmem:[%s3145_s4 + $0xc8] sm:$0xff]  ;;  %v1023_v42 = vld [vmem:[%s3145_s4 + $0xa0] sm:$0xff] }
 0x113   : > { %v923_v1 = vrot.slane %v919_v45, 4  ;;  %v840_v46 = vpop.permute.xlu0 %839  ;;  %v838_v15 = vpop.permute.xlu1 %837  ;;  %v2089_v16 = vpack.c.bf16 %v897_v44, %v895_v2  ;;  %v1024_v2 = vld [vmem:[%s3145_s4 + $0xa8] sm:$0xff]  ;;  %v1031_v43 = vld [vmem:[%s3145_s4 + $0xe0] sm:$0xff]  ;;  %v1030_v44 = vld [vmem:[%s3145_s4 + $0xd8] sm:$0xff] }
 0x114   : > { %v844_v39 = vsel %vm793_vm6, %v840_v46, 0.0  ;;  %v841_v19 = vsel %vm793_vm6, %v838_v15, %v840_v46  ;;  %v1026_v45 = vld [vmem:[%s3145_s4 + $0xb8] sm:$0xff]  ;;  %v1033_v46 = vld [vmem:[%s3145_s4 + $0xf0] sm:$0xff] }
 0x115   : > { %927 = vst [vmem:[#allocation2 + $0x270] sm:$0xf0] %v923_v1  ;;  %v846_v47 = vmul.f32 %v844_v39, %v2723_v29  ;;  %v845_v48 = vmul.f32 %v841_v19, %v2730_v5  ;;  %2090 = vmatpush1.bf16.msra.mxu1 %v2089_v16  ;;  %v1034_v1 = vld [vmem:[%s3145_s4 + $0xf8] sm:$0xff]  ;;  %v1029_v15 = vld [vmem:[%s3145_s4 + $0xd0] sm:$0xff]  ;;  %v1036_v39 = vld [vmem:[%s3145_s4 + $0x108] sm:$0xff] }
 0x116   : > { %v1037_v16 = vld [vmem:[%s3145_s4 + $0x110] sm:$0xff]  ;;  %v1032_v19 = vld [vmem:[%s3145_s4 + $0xe8] sm:$0xff] }
 0x117   : > { %848 = vst [vmem:[#allocation2 + $0x278] sm:$0xf] %v846_v47  ;;  %847 = vst [vmem:[#allocation2 + $0x270] sm:$0xf] %v845_v48  ;;  %v862_v17 = vpop.permute.xlu0 %861  ;;  %v866_v18 = vpop.permute.xlu1 %865  ;;  %v1040_v47 = vld [vmem:[%s3145_s4 + $0x128] sm:$0xff]  ;;  %v1039_v48 = vld [vmem:[%s3145_s4 + $0x120] sm:$0xff] }
 0x118   : > { %v882_v20 = vsel %vm867_vm7, %v862_v17, 0.0  ;;  %v883_v21 = vsel %vm867_vm7, %v866_v18, 0.0  ;;  %v1127_v54 = vld [vmem:[#allocation2 + $0x260] sm:$0xff] }
 0x119   : > { %v900_v22 = vmul.f32 %v2814_v26, %v882_v20  ;;  %v902_v25 = vmul.f32 %v2814_v26, %v883_v21  ;;  %v1042_v20 = vld [vmem:[%s3145_s4 + $0x138] sm:$0xff] }
 0x11a   : > { %v1038_v21 = vld [vmem:[%s3145_s4 + $0x118] sm:$0xff] }
 0x11b   : > { %v860_v49 = vpop.permute.xlu0 %859  ;;  %v864_v0 = vpop.permute.xlu1 %863  ;;  %v2091_v53 = vpack.c.bf16 %v902_v25, %v900_v22  ;;  %v1046_v22 = vld [vmem:[%s3145_s4 + $0x158] sm:$0xff]  ;;  %v1045_v25 = vld [vmem:[%s3145_s4 + $0x150] sm:$0xff] }
 0x11c   : > { %v870_v29 = vsel %vm867_vm7, %v860_v49, %v862_v17  ;;  %v871_v5 = vsel %vm867_vm7, %v864_v0, %v866_v18  ;;  %v1035_v17 = vld [vmem:[%s3145_s4 + $0x100] sm:$0xff]  ;;  %v1041_v49 = vld [vmem:[%s3145_s4 + $0x130] sm:$0xff] }
 0x11d   : > { %v899_v30 = vmul.f32 %v888_v60, %v870_v29  ;;  %v901_v38 = vmul.f32 %v888_v60, %v871_v5  ;;  %2092 = vmatprep.subr.bf16.mxu1 %v2091_v53  ;;  %v1043_v18 = vld [vmem:[%s3145_s4 + $0x140] sm:$0xff]  ;;  %v1049_v0 = vld [vmem:[%s3145_s4 + $0x170] sm:$0xff]  ;;  %v1048_v53 = vld [vmem:[%s3145_s4 + $0x168] sm:$0xff] }
 0x11e   : > { %v1130_v24 = vld [vmem:[#allocation2 + $0x278] sm:$0xff]  ;;  %v1129_v55 = vld [vmem:[#allocation2 + $0x270] sm:$0xff]  ;;  %v1044_v29 = vld [vmem:[%s3145_s4 + $0x148] sm:$0xff] }
 0x11f   : > { %v994_v56 = vpop.permute.xlu0 %993  ;;  %v992_v57 = vpop.permute.xlu1 %991  ;;  %v2107_v50 = vpack.c.bf16 %v1130_v24, %v1128_v23  ;;  %v2109_v52 = vpack.c.bf16 %v1129_v55, %v1127_v54  ;;  %v2093_v11 = vpack.c.bf16 %v901_v38, %v899_v30  ;;  %v1047_v5 = vld [vmem:[%s3145_s4 + $0x160] sm:$0xff]  ;;  %v1050_v30 = vld [vmem:[%s3145_s4 + $0x178] sm:$0xff] }
 0x120   : > { %v998_v26 = vsel %vm947_vm5, %v994_v56, 0.0  ;;  %v995_v59 = vsel %vm947_vm5, %v992_v57, %v994_v56 }
 0x121   : > { %v1000_v61 = vmul.f32 %v998_v26, %v2706_v51  ;;  %v999_v62 = vmul.f32 %v995_v59, %v2713_v58  ;;  %2108 = vmatprep.subr.bf16.mxu0 %v2107_v50  ;;  %2094 = vmatpush1.bf16.msra.mxu1 %v2093_v11  ;;  %v1006_v51 = vld [vmem:[%s3145_s4 + $0x18] sm:$0xff] }
 0x122   : > { %2110 = vmatpush1.bf16.msra.mxu0 %v2109_v52  ;;  %v1010_v58 = vld [vmem:[%s3145_s4 + $0x38] sm:$0xff] }
 0x123   : > { %1002 = vst [vmem:[#allocation2 + $0x288] sm:$0xf] %v1000_v61  ;;  %1001 = vst [vmem:[#allocation2 + $0x280] sm:$0xf] %v999_v62 }
 0x124   : > { %1254 = vmatmul.mubr.f32.vlgmr.msra.gmra.mrb[0].mxu1 %v1003_v8 }
 0x125   : > { %1259 = vmatprep.mubr.f32.mxu1 %v1007_v9 }
 0x128   : > { %1260 = vmatmul.mubr.f32.gmra.mrb[2].mxu1 %v1006_v51 }
 0x129   : > { %1265 = vmatprep.mubr.f32.mxu1 %v1010_v58 }
 0x12a   : > { %v1132_v14 = vld [vmem:[#allocation2 + $0x288] sm:$0xf]  ;;  %v1131_v60 = vld [vmem:[#allocation2 + $0x280] sm:$0xf] }
 0x12b   : > { %2006 = vmatprep.subr.msk.mxu0 %vm1182_vm8, %v1132_v14 }
 0x12c   : > { %2007 = vmatpush1.msk.msra.mxu0 %vm1182_vm8, %v1131_v60  ;;  %1266 = vmatmul.mubr.f32.gmra.mrb[4].mxu1 %v1009_v13 }
 0x12d   : > { %2008 = vmatmul.mubr.msk.f32.vlgmr.msra.gmra.mrb[0].mxu0 %vm1133_vm9, %v1005_v12  ;;  %1271 = vmatprep.mubr.f32.mxu1 %v1013_v63 }
 0x12e   : > { %1420 = vmatprep.mubr.f32.mxu0 %v2260_v7 }
 0x130   : > { %1272 = vmatmul.mubr.f32.gmra.mrb[6].mxu1 %v1012_v32 }
 0x131   : > { %2009 = vmatmul.mubr.msk.f32.gmra.mrb[2].mxu0 %vm1133_vm9, %v1008_v4  ;;  %1277 = vmatprep.mubr.f32.mxu1 %v1016_v6 }
 0x132   : > { %1426 = vmatprep.mubr.f32.mxu0 %v2260_v7 }
 0x134   : > { %1278 = vmatmul.mubr.f32.gmra.mrb[8].mxu1 %v1015_v31 }
 0x135   : > { %2010 = vmatmul.mubr.msk.f32.gmra.mrb[4].mxu0 %vm1133_vm9, %v1011_v3  ;;  %1283 = vmatprep.mubr.f32.mxu1 %v1019_v33 }
 0x136   : > { %1432 = vmatprep.mubr.f32.mxu0 %v2260_v7 }
 0x138   : > { %1284 = vmatmul.mubr.f32.gmra.mrb[10].mxu1 %v1018_v34 }
 0x139   : > { %2011 = vmatmul.mubr.msk.f32.gmra.mrb[6].mxu0 %vm1133_vm9, %v1014_v35  ;;  %1289 = vmatprep.mubr.f32.mxu1 %v1022_v36 }
 0x13a   : > { %1438 = vmatprep.mubr.f32.mxu0 %v2260_v7 }
 0x13c   : > { %1290 = vmatmul.mubr.f32.gmra.mrb[12].mxu1 %v1021_v40 }
 0x13d   : > { %2012 = vmatmul.mubr.msk.f32.gmra.mrb[8].mxu0 %vm1133_vm9, %v1017_v41  ;;  %1295 = vmatprep.mubr.f32.mxu1 %v1025_v37 }
 0x13e   : > { %1444 = vmatprep.mubr.f32.mxu0 %v2260_v7 }
 0x140   : > { %1296 = vmatmul.mubr.f32.gmra.mrb[14].mxu1 %v1024_v2 }
 0x141   : > { %2013 = vmatmul.mubr.msk.f32.gmra.mrb[10].mxu0 %vm1133_vm9, %v1020_v10  ;;  %1301 = vmatprep.mubr.f32.mxu1 %v1028_v28 }
 0x142   : > { %1450 = vmatprep.mubr.f32.mxu0 %v2260_v7 }
 0x144   : > { %1302 = vmatmul.mubr.f32.gmra.mrb[16].mxu1 %v1027_v27 }
 0x145   : > { %2014 = vmatmul.mubr.msk.f32.gmra.mrb[12].mxu0 %vm1133_vm9, %v1023_v42  ;;  %1307 = vmatprep.mubr.f32.mxu1 %v1031_v43 }
 0x146   : > { %1456 = vmatprep.mubr.f32.mxu0 %v2260_v7 }
 0x148   : > { %1308 = vmatmul.mubr.f32.gmra.mrb[18].mxu1 %v1030_v44 }
 0x149   : > { %2015 = vmatmul.mubr.msk.f32.gmra.mrb[14].mxu0 %vm1133_vm9, %v1026_v45  ;;  %1313 = vmatprep.mubr.f32.mxu1 %v1034_v1 }
 0x14a   : > { %1462 = vmatprep.mubr.f32.mxu0 %v2260_v7 }
 0x14c   : > { %1314 = vmatmul.mubr.f32.gmra.mrb[20].mxu1 %v1033_v46 }
 0x14d   : > { %2016 = vmatmul.mubr.msk.f32.gmra.mrb[16].mxu0 %vm1133_vm9, %v1029_v15  ;;  %1319 = vmatprep.mubr.f32.mxu1 %v1037_v16 }
 0x14e   : > { %1468 = vmatprep.mubr.f32.mxu0 %v2260_v7 }
 0x150   : > { %1320 = vmatmul.mubr.f32.gmra.mrb[22].mxu1 %v1036_v39 }
 0x151   : > { %2017 = vmatmul.mubr.msk.f32.gmra.mrb[18].mxu0 %vm1133_vm9, %v1032_v19  ;;  %1325 = vmatprep.mubr.f32.mxu1 %v1040_v47 }
 0x152   : > { %1474 = vmatprep.mubr.f32.mxu0 %v2260_v7 }
 0x154   : > { %1326 = vmatmul.mubr.f32.gmra.mrb[24].mxu1 %v1039_v48  ;;  %v1563_v60 = vpop.permute.xlu1 %1562  ;;  %v1558_v33 = vpop.permute.xlu0 %1557 }
 0x155   : > { %2018 = vmatmul.mubr.msk.f32.gmra.mrb[20].mxu0 %vm1133_vm9, %v1035_v17  ;;  %1331 = vmatprep.mubr.f32.mxu1 %v1043_v18 }
 0x156   : > { %1480 = vmatprep.mubr.f32.mxu0 %v2260_v7 }
 0x158   : > { %1332 = vmatmul.mubr.f32.gmra.mrb[26].mxu1 %v1042_v20  ;;  %v1568_v40 = vpop.permute.xlu1 %1567 }
 0x159   : > { %2019 = vmatmul.mubr.msk.f32.gmra.mrb[22].mxu0 %vm1133_vm9, %v1038_v21  ;;  %1337 = vmatprep.mubr.f32.mxu1 %v1046_v22  ;;  %v1573_v10 = vpop.permute.xlu0 %1572 }
 0x15a   : > { %1486 = vmatprep.mubr.f32.mxu0 %v2260_v7 }
 0x15c   : > { %1338 = vmatmul.mubr.f32.gmra.mrb[28].mxu1 %v1045_v25  ;;  %v1630_v43 = vpop.permute.xlu1 %1629 }
 0x15d   : > { %2020 = vmatmul.mubr.msk.f32.gmra.mrb[24].mxu0 %vm1133_vm9, %v1041_v49  ;;  %1343 = vmatprep.mubr.f32.mxu1 %v1049_v0 }
 0x15e   : > { %1492 = vmatprep.mubr.f32.mxu0 %v2260_v7 }
 0x160   : > { %1344 = vmatmul.mubr.f32.gmra.mrb[30].mxu1 %v1048_v53  ;;  %v1640_v22 = vpop.permute.xlu1 %1639 }
 0x161   : > { %2021 = vmatmul.mubr.msk.f32.gmra.mrb[26].mxu0 %vm1133_vm9, %v1044_v29 }
 0x162   : > { %1498 = vmatprep.mubr.f32.mxu0 %v2260_v7 }
 0x165   : > { %2022 = vmatmul.mubr.msk.f32.gmra.mrb[28].mxu0 %vm1133_vm9, %v1047_v5 }
 0x166   : > { %1504 = vmatprep.mubr.f32.mxu0 %v2260_v7 }
 0x169   : > { %2023 = vmatmul.mubr.msk.f32.gmra.mrb[30].mxu0 %vm1133_vm9, %v1050_v30 }
 0x16d   : > { %v1635_v48 = vpop.permute.xlu0 %1634 }
 0x1f7   : > { %v1255_v38 = vpop.f32.mrb[0].mxu1 }
 0x1f8   : > { %v1257_v23 = vpop.f32.mrb[1].mxu1 }
 0x1fb   : > { %v1261_v24 = vpop.f32.mrb[2].mxu1 }
 0x1fc   : > { %v1263_v54 = vpop.f32.mrb[3].mxu1 }
 0x1ff   : > { %v1267_v55 = vpop.f32.mrb[4].mxu1 }
 0x200   : > { %v1416_v56 = vpop.f32.mrb[0].mxu0  ;;  %v1269_v57 = vpop.f32.mrb[5].mxu1 }
 0x201   : > { %v1417_v50 = vadd.f32 %v1416_v56, %v1255_v38  ;;  %v1418_v52 = vpop.f32.mrb[1].mxu0 }
 0x202   : > { %v1419_v11 = vadd.f32 %v1418_v52, %v1257_v23 }
 0x203   : > { %v1273_v26 = vpop.f32.mrb[6].mxu1  ;;  %v1575_v46 = vadd.f32 %v1558_v33, %v1417_v50 }
 0x204   : > { %v1422_v59 = vpop.f32.mrb[2].mxu0  ;;  %v1275_v61 = vpop.f32.mrb[7].mxu1  ;;  %v1576_v16 = vadd.f32 %v1558_v33, %v1419_v11 }
 0x205   : > { %v1423_v7 = vadd.f32 %v1422_v59, %v1261_v24  ;;  %v1424_v62 = vpop.f32.mrb[3].mxu0  ;;  %v1583_v21 = vmul.f32 0.5, %v1575_v46  ;;  %v3030_v59 = vpop.permute.xlu1 %1773 }
 0x206   : > { %v1425_v8 = vadd.f32 %v1424_v62, %v1263_v54  ;;  %v1584_v49 = vmul.f32 0.5, %v1576_v16  ;;  %v3028_v54 = vpop.permute.xlu0 %1644 }
 0x207   : > { %v1279_v9 = vpop.f32.mrb[8].mxu1  ;;  %v1577_v47 = vadd.f32 %v1563_v60, %v1423_v7  ;;  %2164 = vtanh.f32 %v1583_v21 }
 0x208   : > { %v1428_v51 = vpop.f32.mrb[4].mxu0  ;;  %v1281_v58 = vpop.f32.mrb[9].mxu1  ;;  %v1578_v0 = vadd.f32 %v1563_v60, %v1425_v8  ;;  %2166 = vtanh.f32 %v1584_v49 }
 0x209   : > { %v1429_v12 = vadd.f32 %v1428_v51, %v1267_v55  ;;  %v1430_v13 = vpop.f32.mrb[5].mxu0  ;;  %v1585_v5 = vmul.f32 0.5, %v1577_v47 }
 0x20a   : > { %v1431_v14 = vadd.f32 %v1430_v13, %v1269_v57  ;;  %v1586_v56 = vmul.f32 0.5, %v1578_v0 }
 0x20b   : > { %v1285_v63 = vpop.f32.mrb[10].mxu1  ;;  %v1579_v57 = vadd.f32 %v1568_v40, %v1429_v12  ;;  %2168 = vtanh.f32 %v1585_v5  ;;  %v3034_v12 = vpop.permute.xlu0 %1778 }
 0x20c   : > { %v1434_v32 = vpop.f32.mrb[6].mxu0  ;;  %v1287_v4 = vpop.f32.mrb[11].mxu1  ;;  %v1580_v8 = vadd.f32 %v1568_v40, %v1431_v14  ;;  %2170 = vtanh.f32 %v1586_v56 }
 0x20d   : > { %v3022_v6 = vadd.f32 %v1434_v32, %v1273_v26  ;;  %v1436_v31 = vpop.f32.mrb[7].mxu0  ;;  %v1587_v51 = vmul.f32 0.5, %v1579_v57 }
 0x20e   : > { %v3024_v3 = vadd.f32 %v1436_v31, %v1275_v61 }
 0x20f   : > { %v1291_v34 = vpop.f32.mrb[12].mxu1  ;;  %v1581_v31 = vadd.f32 %v1573_v10, %v3022_v6 }
 0x210   : > { %v1440_v35 = vpop.f32.mrb[8].mxu0  ;;  %v1293_v36 = vpop.f32.mrb[13].mxu1  ;;  %v1582_v14 = vadd.f32 %v1573_v10, %v3024_v3 }
 0x211   : > { %v1441_v41 = vadd.f32 %v1440_v35, %v1279_v9  ;;  %v1442_v37 = vpop.f32.mrb[9].mxu0  ;;  %v3042_v35 = vpop.permute.xlu1 %1783 }
 0x212   : > { %v1443_v2 = vadd.f32 %v1442_v37, %v1281_v58  ;;  %v1590_v3 = vmul.f32 0.5, %v1582_v14 }
 0x213   : > { %v1297_v28 = vpop.f32.mrb[14].mxu1  ;;  %v1647_v30 = vadd.f32 %v1630_v43, %v1441_v41 }
 0x214   : > { %v1446_v27 = vpop.f32.mrb[10].mxu0  ;;  %v1299_v42 = vpop.f32.mrb[15].mxu1  ;;  %v1648_v11 = vadd.f32 %v1630_v43, %v1443_v2 }
 0x215   : > { %v1447_v44 = vadd.f32 %v1446_v27, %v1285_v63  ;;  %v1448_v45 = vpop.f32.mrb[11].mxu0  ;;  %v1655_v26 = vmul.f32 0.5, %v1647_v30 }
 0x216   : > { %v1449_v1 = vadd.f32 %v1448_v45, %v1287_v4  ;;  %v1656_v63 = vmul.f32 0.5, %v1648_v11 }
 0x217   : > { %v1303_v15 = vpop.f32.mrb[16].mxu1  ;;  %v1649_v58 = vadd.f32 %v1635_v48, %v1447_v44  ;;  %2172 = vtanh.f32 %v1655_v26  ;;  %v1589_v44 = vmul.f32 0.5, %v1581_v31 }
 0x218   : > { %v1452_v39 = vpop.f32.mrb[12].mxu0  ;;  %v1305_v19 = vpop.f32.mrb[17].mxu1  ;;  %2174 = vtanh.f32 %v1587_v51  ;;  %v1650_v40 = vadd.f32 %v1635_v48, %v1449_v1 }
 0x219   : > { %v1453_v17 = vadd.f32 %v1452_v39, %v1291_v34  ;;  %v1454_v18 = vpop.f32.mrb[13].mxu0  ;;  %v1588_v34 = vmul.f32 0.5, %v1580_v8  ;;  %v1657_v41 = vmul.f32 0.5, %v1649_v58  ;;  %2176 = vtanh.f32 %v1656_v63 }
 0x21a   : > { %v1455_v20 = vadd.f32 %v1454_v18, %v1293_v36  ;;  %v1658_v16 = vmul.f32 0.5, %v1650_v40  ;;  %v1702_v18 = vpop.permute.xlu1 %1701 }
 0x21b   : > { %v1309_v25 = vpop.f32.mrb[18].mxu1  ;;  %v1651_v27 = vadd.f32 %v1640_v22, %v1453_v17  ;;  %2178 = vtanh.f32 %v1588_v34 }
 0x21c   : > { %v1458_v53 = vpop.f32.mrb[14].mxu0  ;;  %v1311_v29 = vpop.f32.mrb[19].mxu1  ;;  %v1652_v10 = vadd.f32 %v1640_v22, %v1455_v20  ;;  %2180 = vtanh.f32 %v1657_v41 }
 0x21d   : > { %v1459_v38 = vadd.f32 %v1458_v53, %v1297_v28  ;;  %v1460_v23 = vpop.f32.mrb[15].mxu0  ;;  %v2165_v28 = vpop.eup %2164  ;;  %v1659_v17 = vmul.f32 0.5, %v1651_v27  ;;  %2182 = vtanh.f32 %v1589_v44 }
 0x21e   : > { %v3026_v24 = vadd.f32 %v1460_v23, %v1299_v42  ;;  %v2167_v6 = vpop.eup %2166  ;;  %v1599_v48 = vmul.f32 0.5, %v2165_v28  ;;  %2184 = vtanh.f32 %v1590_v3 }
 0x21f   : > { %v1315_v55 = vpop.f32.mrb[20].mxu1  ;;  %v2169_v46 = vpop.eup %2168  ;;  %v1653_v39 = vadd.f32 %v3028_v54, %v1459_v38  ;;  %v1600_v0 = vmul.f32 0.5, %v2167_v6  ;;  %2186 = vtanh.f32 %v1658_v16 }
 0x220   : > { %v1464_v50 = vpop.f32.mrb[16].mxu0  ;;  %v1317_v52 = vpop.f32.mrb[21].mxu1  ;;  %v1601_v53 = vmul.f32 0.5, %v2169_v46  ;;  %v1654_v5 = vadd.f32 %v3028_v54, %v3026_v24  ;;  %v3057_v57 = vadd.f32 0.5, %v1599_v48  ;;  %2188 = vtanh.f32 %v1659_v17 }
 0x221   : > { %v1465_v61 = vadd.f32 %v1464_v50, %v1303_v15  ;;  %v1466_v7 = vpop.f32.mrb[17].mxu0  ;;  %v3048_v15 = vpop.permute.xlu0 %1788  ;;  %v1661_v38 = vmul.f32 0.5, %v1653_v39  ;;  %v3059_v8 = vadd.f32 0.5, %v1600_v0 }
 0x222   : > { %v3032_v62 = vadd.f32 %v1466_v7, %v1305_v19  ;;  %v2171_v49 = vpop.eup %2170  ;;  %v1662_v58 = vmul.f32 0.5, %v1654_v5 }
 0x223   : > { %v1321_v9 = vpop.f32.mrb[22].mxu1  ;;  %v2173_v22 = vpop.eup %2172  ;;  %v1719_v23 = vadd.f32 %v1702_v18, %v1465_v61  ;;  %v1602_v50 = vmul.f32 0.5, %v2171_v49 }
 0x224   : > { %v1470_v13 = vpop.f32.mrb[18].mxu0  ;;  %v1323_v60 = vpop.f32.mrb[23].mxu1  ;;  %v1671_v51 = vmul.f32 0.5, %v2173_v22  ;;  %v1720_v61 = vadd.f32 %v1702_v18, %v3032_v62 }
 0x225   : > { %v3036_v32 = vadd.f32 %v1470_v13, %v1309_v25  ;;  %v1472_v4 = vpop.f32.mrb[19].mxu0  ;;  %v2175_v7 = vpop.eup %2174  ;;  %v1727_v63 = vmul.f32 0.5, %v1719_v23  ;;  %v3067_v40 = vadd.f32 0.5, %v1602_v50 }
 0x226   : > { %v3039_v33 = vadd.f32 %v1472_v4, %v1311_v29  ;;  %v1660_v29 = vmul.f32 0.5, %v1652_v10  ;;  %v2177_v54 = vpop.eup %2176  ;;  %v1603_v41 = vmul.f32 0.5, %v2175_v7 }
 0x227   : > { %v1327_v36 = vpop.f32.mrb[24].mxu1  ;;  %v1672_v27 = vmul.f32 0.5, %v2177_v54 }
 0x228   : > { %v1476_v37 = vpop.f32.mrb[20].mxu0  ;;  %v1329_v2 = vpop.f32.mrb[25].mxu1  ;;  %2190 = vtanh.f32 %v1660_v29 }
 0x229   : > { %v3044_v42 = vadd.f32 %v1476_v37, %v1315_v55  ;;  %v1478_v43 = vpop.f32.mrb[21].mxu0  ;;  %2192 = vtanh.f32 %v1661_v38  ;;  %v1712_v37 = vpop.permute.xlu1 %1711  ;;  %v1680_v49 = vadd.f32 0.5, %v1672_v27 }
 0x22a   : > { %v3046_v45 = vadd.f32 %v1478_v43, %v1317_v52  ;;  %v1707_v52 = vpop.permute.xlu0 %1706  ;;  %v1728_v43 = vmul.f32 0.5, %v1720_v61 }
 0x22b   : > { %v1333_v1 = vpop.f32.mrb[26].mxu1  ;;  %v1721_v4 = vadd.f32 %v1707_v52, %v3036_v32  ;;  %v1679_v32 = vadd.f32 0.5, %v1671_v51  ;;  %v1722_v6 = vadd.f32 %v1707_v52, %v3039_v33  ;;  %v1723_v10 = vadd.f32 %v1712_v37, %v3044_v42 }
 0x22c   : > { %v1482_v19 = vpop.f32.mrb[22].mxu0  ;;  %v1335_v47 = vpop.f32.mrb[27].mxu1 }
 0x22d   : > { %v3051_v21 = vadd.f32 %v1482_v19, %v1321_v9  ;;  %v1484_v25 = vpop.f32.mrb[23].mxu0  ;;  %v3061_v9 = vadd.f32 0.5, %v1601_v53  ;;  %v1729_v3 = vmul.f32 0.5, %v1721_v4  ;;  %v1724_v53 = vadd.f32 %v1712_v37, %v3046_v45 }
 0x22e   : > { %v3053_v20 = vadd.f32 %v1484_v25, %v1323_v60  ;;  %v3086_v25 = vadd.f32 0.5, %v1603_v41  ;;  %v1731_v5 = vmul.f32 0.5, %v1723_v10  ;;  %v1810_v41 = vld [vmem:[%s3073_s20 + $0x18] sm:$0xff] }
 0x22f   : > { %v1339_v30 = vpop.f32.mrb[28].mxu1 }
 0x230   : > { %v1488_v55 = vpop.f32.mrb[24].mxu0  ;;  %v1341_v56 = vpop.f32.mrb[29].mxu1 }
 0x231   : > { %v1489_v11 = vadd.f32 %v1488_v55, %v1327_v36  ;;  %v1490_v26 = vpop.f32.mrb[25].mxu0  ;;  %v2179_v36 = vpop.eup %2178  ;;  %v1808_v55 = vld [vmem:[%s3073_s20 + $0x8] sm:$0xff] }
 0x232   : > { %v1491_v24 = vadd.f32 %v1490_v26, %v1329_v2  ;;  %v2181_v28 = vpop.eup %2180  ;;  %v3083_v19 = vmul.f32 0.5, %v2179_v36  ;;  %v1816_v4 = vmul.f32 %v1808_v55, %v1680_v49 }
 0x233   : > { %v1791_v13 = vadd.f32 %v3030_v59, %v1489_v11  ;;  %v1345_v60 = vpop.f32.mrb[30].mxu1  ;;  %v3077_v46 = vpop.eup %2182  ;;  %v1673_v48 = vmul.f32 0.5, %v2181_v28 }
 0x234   : > { %v1792_v31 = vadd.f32 %v3030_v59, %v1491_v24  ;;  %v1494_v34 = vpop.f32.mrb[26].mxu0  ;;  %v1347_v14 = vpop.f32.mrb[31].mxu1 }
 0x235   : > { %2194 = vtanh.f32 %v1791_v13  ;;  %v1495_v2 = vadd.f32 %v1494_v34, %v1333_v1  ;;  %v1496_v62 = vpop.f32.mrb[27].mxu0  ;;  %v3081_v39 = vpop.eup %2184  ;;  %v1681_v52 = vadd.f32 0.5, %v1673_v48  ;;  %v1605_v48 = vmul.f32 0.5, %v3077_v46 }
 0x236   : > { %2196 = vtanh.f32 %v1792_v31  ;;  %v1497_v59 = vadd.f32 %v1496_v62, %v1335_v47  ;;  %v1807_v47 = vld [vmem:[%s3073_s20] sm:$0xff]  ;;  %v2187_v18 = vpop.eup %2186  ;;  %v1717_v11 = vpop.permute.xlu0 %1716 }
 0x237   : > { %2198 = vtanh.f32 %v1662_v58  ;;  %v1793_v44 = vadd.f32 %v3034_v12, %v1495_v2  ;;  %v2189_v42 = vpop.eup %2188  ;;  %v1815_v29 = vmul.f32 %v1807_v47, %v1679_v32  ;;  %v1674_v50 = vmul.f32 0.5, %v2187_v18  ;;  %v1809_v58 = vld [vmem:[%s3073_s20 + $0x10] sm:$0xff] }
 0x238   : > { %2200 = vtanh.f32 %v1727_v63  ;;  %v1794_v1 = vadd.f32 %v3034_v12, %v1497_v59  ;;  %v1500_v16 = vpop.f32.mrb[28].mxu0  ;;  %v1730_v12 = vmul.f32 0.5, %v1722_v6  ;;  %v2191_v23 = vpop.eup %2190  ;;  %v1675_v51 = vmul.f32 0.5, %v2189_v42  ;;  %v1811_v59 = vld [vmem:[%s3073_s20 + $0x20] sm:$0xff] }
 0x239   : > { %2202 = vtanh.f32 %v1793_v44  ;;  %v1501_v17 = vadd.f32 %v1500_v16, %v1339_v30  ;;  %v1502_v33 = vpop.f32.mrb[29].mxu0  ;;  %v2193_v7 = vpop.eup %2192  ;;  %v1725_v45 = vadd.f32 %v1717_v11, %v3051_v21  ;;  %v1726_v61 = vadd.f32 %v1717_v11, %v3053_v20 }
 0x23a   : > { %2204 = vtanh.f32 %v1794_v1  ;;  %v1503_v0 = vadd.f32 %v1502_v33, %v1341_v56  ;;  %v1682_v34 = vadd.f32 0.5, %v1674_v50  ;;  %v1676_v36 = vmul.f32 0.5, %v2191_v23 }
 0x23b   : > { %2206 = vtanh.f32 %v1728_v43  ;;  %v1795_v22 = vadd.f32 %v3042_v35, %v1501_v17  ;;  %v1817_v37 = vmul.f32 %v1809_v58, %v1681_v52  ;;  %v1733_v2 = vmul.f32 0.5, %v1725_v45  ;;  %v1812_v17 = vld [vmem:[%s3073_s20 + $0x28] sm:$0xff] }
 0x23c   : > { %2208 = vtanh.f32 %v1729_v3  ;;  %v1796_v30 = vadd.f32 %v3042_v35, %v1503_v0  ;;  %v1506_v38 = vpop.f32.mrb[30].mxu0  ;;  %v1732_v35 = vmul.f32 0.5, %v1724_v53  ;;  %v1683_v62 = vadd.f32 0.5, %v1675_v51 }
 0x23d   : > { %2210 = vtanh.f32 %v1795_v22  ;;  %v1507_v56 = vadd.f32 %v1506_v38, %v1345_v60  ;;  %v1508_v26 = vpop.f32.mrb[31].mxu0  ;;  %v1734_v28 = vmul.f32 0.5, %v1726_v61  ;;  %v1677_v43 = vmul.f32 0.5, %v2193_v7  ;;  %v1813_v22 = vld [vmem:[%s3073_s20 + $0x30] sm:$0xff] }
 0x23e   : > { %2212 = vtanh.f32 %v1796_v30  ;;  %v1509_v24 = vadd.f32 %v1508_v26, %v1347_v14  ;;  %v1818_v3 = vmul.f32 %v1810_v41, %v1682_v34  ;;  %v1684_v10 = vadd.f32 0.5, %v1676_v36 }
 0x23f   : > { %v2195_v54 = vpop.eup %2194  ;;  %2214 = vtanh.f32 %v1730_v12  ;;  %v1797_v13 = vadd.f32 %v3048_v15, %v1507_v56  ;;  %v1612_v47 = vadd.f32 0.5, %v3083_v19  ;;  %v1819_v49 = vmul.f32 %v1811_v59, %v1683_v62 }
 0x240   : > { %v2197_v63 = vpop.eup %2196  ;;  %2216 = vtanh.f32 %v1731_v5  ;;  %v1823_v60 = vmul.f32 %v2195_v54, %v3057_v57  ;;  %v1798_v31 = vadd.f32 %v3048_v15, %v1509_v24  ;;  %v1820_v53 = vmul.f32 %v1812_v17, %v1684_v10 }
 0x241   : > { %v2199_v21 = vpop.eup %2198  ;;  %v1824_v20 = vmul.f32 %v2197_v63, %v3059_v8  ;;  %2218 = vtanh.f32 %v1797_v13  ;;  %v1613_v38 = vadd.f32 0.5, %v1605_v48 }
 0x242   : > { %v2201_v14 = vpop.eup %2200  ;;  %v1831_v57 = vadd.f32 %v1823_v60, %v1815_v29  ;;  %2220 = vtanh.f32 %v1798_v31  ;;  %v1678_v6 = vmul.f32 0.5, %v2199_v21  ;;  %v1814_v29 = vld [vmem:[%s3073_s20 + $0x38] sm:$0xff] }
 0x243   : > { %v2203_v15 = vpop.eup %2202  ;;  %2222 = vtanh.f32 %v1732_v35  ;;  %v1832_v27 = vadd.f32 %v1824_v20, %v1816_v4  ;;  %v1743_v5 = vmul.f32 0.5, %v2201_v14 }
 0x244   : > { %v2205_v32 = vpop.eup %2204  ;;  %2224 = vtanh.f32 %v1831_v57  ;;  %1855 = vst [vmem:[%s3102_s23] sm:$0xff] %v1831_v57  ;;  %v1825_v8 = vmul.f32 %v2203_v15, %v3061_v9  ;;  %v1606_v9 = vmul.f32 0.5, %v3081_v39  ;;  %v1686_v12 = vadd.f32 0.5, %v1678_v6 }
 0x245   : > { %v2207_v44 = vpop.eup %2206  ;;  %2226 = vtanh.f32 %v1832_v27  ;;  %1856 = vst [vmem:[%s3102_s23 + $0x8] sm:$0xff] %v1832_v27  ;;  %v1826_v1 = vmul.f32 %v2205_v32, %v3067_v40  ;;  %v1685_v40 = vadd.f32 0.5, %v1677_v43  ;;  %v1751_v45 = vadd.f32 0.5, %v1743_v5 }
 0x246   : > { %v2209_v16 = vpop.eup %2208  ;;  %2228 = vtanh.f32 %v1733_v2  ;;  %v1833_v33 = vadd.f32 %v1825_v8, %v1817_v37  ;;  %v1744_v23 = vmul.f32 0.5, %v2207_v44  ;;  %v1614_v52 = vadd.f32 0.5, %v1606_v9 }
 0x247   : > { %v2211_v18 = vpop.eup %2210  ;;  %2230 = vtanh.f32 %v1734_v28  ;;  %v1834_v0 = vadd.f32 %v1826_v1, %v1818_v3  ;;  %v1822_v26 = vmul.f32 %v1814_v29, %v1686_v12  ;;  %v1745_v24 = vmul.f32 0.5, %v2209_v16 }
 0x248   : > { %v2213_v42 = vpop.eup %2212  ;;  %2232 = vtanh.f32 %v1833_v33  ;;  %1857 = vst [vmem:[%s3102_s23 + $0x10] sm:$0xff] %v1833_v33  ;;  %v1827_v19 = vmul.f32 %v2211_v18, %v3086_v25  ;;  %v1821_v25 = vmul.f32 %v1813_v22, %v1685_v40  ;;  %v1752_v35 = vadd.f32 0.5, %v1744_v23 }
 0x249   : > { %v2215_v46 = vpop.eup %2214  ;;  %2234 = vtanh.f32 %v1834_v0  ;;  %1858 = vst [vmem:[%s3102_s23 + $0x18] sm:$0xff] %v1834_v0  ;;  %v1828_v39 = vmul.f32 %v2213_v42, %v1612_v47  ;;  %v1753_v36 = vadd.f32 0.5, %v1745_v24 }
 0x24a   : > { %v2217_v30 = vpop.eup %2216  ;;  %v1835_v55 = vadd.f32 %v1827_v19, %v1819_v49  ;;  %v1746_v61 = vmul.f32 0.5, %v2215_v46 }
 0x24b   : > { %v2219_v50 = vpop.eup %2218  ;;  %v1836_v11 = vadd.f32 %v1828_v39, %v1820_v53  ;;  %v1747_v20 = vmul.f32 0.5, %v2217_v30 }
 0x24c   : > { %v2221_v56 = vpop.eup %2220  ;;  %2236 = vtanh.f32 %v1835_v55  ;;  %1859 = vst [vmem:[%s3102_s23 + $0x20] sm:$0xff] %v1835_v55  ;;  %v1829_v7 = vmul.f32 %v2219_v50, %v1613_v38  ;;  %v1754_v41 = vadd.f32 0.5, %v1746_v61 }
 0x24d   : > { %v2223_v51 = vpop.eup %2222  ;;  %2238 = vtanh.f32 %v1836_v11  ;;  %1860 = vst [vmem:[%s3102_s23 + $0x28] sm:$0xff] %v1836_v11  ;;  %v1830_v54 = vmul.f32 %v2221_v56, %v1614_v52  ;;  %v1755_v62 = vadd.f32 0.5, %v1747_v20 }
 0x24e   : > { %v2225_v58 = vpop.eup %2224  ;;  %v1837_v13 = vadd.f32 %v1829_v7, %v1821_v25  ;;  %v1748_v37 = vmul.f32 0.5, %v2223_v51 }
 0x24f   : > { %v2227_v63 = vpop.eup %2226  ;;  %v1847_v4 = vmul.f32 %v2225_v58, %v1751_v45  ;;  %v1838_v60 = vadd.f32 %v1830_v54, %v1822_v26 }
 0x250   : > { %v2229_v31 = vpop.eup %2228  ;;  %v1848_v21 = vmul.f32 %v2227_v63, %v1752_v35  ;;  %2240 = vtanh.f32 %v1837_v13  ;;  %1861 = vst [vmem:[%s3102_s23 + $0x30] sm:$0xff] %v1837_v13  ;;  %v1756_v32 = vadd.f32 0.5, %v1748_v37 }
 0x251   : > { %v2231_v34 = vpop.eup %2230  ;;  %1863 = vst [vmem:[%s3126_s28] sm:$0xff] %v1847_v4  ;;  %2242 = vtanh.f32 %v1838_v60  ;;  %1862 = vst [vmem:[%s3102_s23 + $0x38] sm:$0xff] %v1838_v60  ;;  %v1749_v28 = vmul.f32 0.5, %v2229_v31 }
 0x252   : > { %v2233_v14 = vpop.eup %2232  ;;  %1864 = vst [vmem:[%s3126_s28 + $0x8] sm:$0xff] %v1848_v21  ;;  %v1750_v59 = vmul.f32 0.5, %v2231_v34 }
 0x253   : > { %v2235_v2 = vpop.eup %2234  ;;  %v1849_v57 = vmul.f32 %v2233_v14, %v1753_v36  ;;  %v1757_v44 = vadd.f32 0.5, %v1749_v28 }
 0x254   : > { %v1850_v15 = vmul.f32 %v2235_v2, %v1754_v41  ;;  %v1758_v10 = vadd.f32 0.5, %v1750_v59 }
 0x255   : > { %1865 = vst [vmem:[%s3126_s28 + $0x10] sm:$0xff] %v1849_v57 }
 0x256   : > { %v2237_v27 = vpop.eup %2236  ;;  %1866 = vst [vmem:[%s3126_s28 + $0x18] sm:$0xff] %v1850_v15 }
 0x257   : > { %v2239_v43 = vpop.eup %2238  ;;  %v1851_v6 = vmul.f32 %v2237_v27, %v1755_v62 }
 0x258   : > { %v1852_v8 = vmul.f32 %v2239_v43, %v1756_v32 }
 0x259   : > { %1867 = vst [vmem:[%s3126_s28 + $0x20] sm:$0xff] %v1851_v6 }
 0x25a   : > { %v2241_v3 = vpop.eup %2240  ;;  %1868 = vst [vmem:[%s3126_s28 + $0x28] sm:$0xff] %v1852_v8 }
 0x25b   : > { %v2243_v1 = vpop.eup %2242  ;;  %v1853_v16 = vmul.f32 %v2241_v3, %v1757_v44 }
 0x25c   : > { %v1854_v47 = vmul.f32 %v2243_v1, %v1758_v10 }
 0x25d   : > { %1869 = vst [vmem:[%s3126_s28 + $0x30] sm:$0xff] %v1853_v16 }
 0x25e   : > { %1870 = vst [vmem:[%s3126_s28 + $0x38] sm:$0xff] %v1854_v47 }
 0x25f PF: > { %s18_s24 = sadd.s32 1, %s2250_s24  }
 0x260   : > { %p15_p4 = scmp.ge.s32.totalorder %s18_s24, 4  }
 0x262   :  { %17 = sbr.rel (!%p15_p4) target bundleno = 1 (0x1), region = 100 }

</bundles_post_ra>
